<compile_context>
chip_gen: v7x
topology: tpu7x:2x2x1
jax: 0.10.0
libtpu: 0.0.40
codegen_flags: <defaults>
</compile_context>

<pallas_src>
import functools
from math import sqrt

import jax
import jax.numpy as jnp
from jax.experimental import pallas as pl
from jax.experimental.pallas import tpu as pltpu


def _round_up(x, m):
    return (x + m - 1) // m * m


def _pick_vmem_limit():
    """Per-generation VMEM ceiling (leave headroom below physical capacity)."""
    try:
        cap = int(pltpu.get_tpu_info().vmem_capacity_bytes)
        return min(cap - 8 * 1024 * 1024, 96 * 1024 * 1024)   # v5e/v6e ~96M, v7x ~56M
    except Exception:
        return 48 * 1024 * 1024                               # safe on all generations


# ----------------------------------------------------------------------------
# Fused Pallas kernel: all Postnet layers for one batch element per grid step.
# ----------------------------------------------------------------------------
def postnet_fused_kernel(*refs, K, T, halo, n_layers, cps):
    # refs = (x_ref, w_0..w_{L-1}, b_0..b_{L-1}, o_ref, buf_a, buf_b)
    #   x_ref : (1, T, cps[0])            channel-padded input (compute dtype)
    #   w_i   : (K, cps[i], cps[i+1])     BN-folded, per-layer-padded weights
    #   b_i   : (1, cps[i+1])             BN-folded biases (f32)
    #   o_ref : (1, T, cps[-1])           f32 output
    #   buf_a, buf_b : (T_scr, Cmax)      VMEM ping-pong activation buffers
    x_ref = refs[0]
    w_refs = refs[1:1 + n_layers]
    b_refs = refs[1 + n_layers:1 + 2 * n_layers]
    o_ref = refs[1 + 2 * n_layers]
    buf_a = refs[2 + 2 * n_layers]
    buf_b = refs[3 + 2 * n_layers]

    pad = (K - 1) // 2
    cmax = buf_a.shape[1]

    # Zero ONLY the conv halo rows (pad rows above / below the data window) of
    # both ping-pong buffers.  Done every grid step (not program_id-guarded) so
    # it remains correct when the batch axis is megacore-sharded.
    if pad > 0:
        zrow = jnp.zeros((pad, cmax), buf_a.dtype)
        for buf in (buf_a, buf_b):
            buf[halo - pad:halo, :] = zrow
            buf[halo + T:halo + T + pad, :] = zrow

    # Stage the input once (sublane-aligned store at row offset `halo`).
    # TODO(synk): layer 0 could read x_ref directly and skip this staging copy.
    buf_a[halo:halo + T, :cps[0]] = x_ref[0]

    bufs = (buf_a, buf_b)
    for layer in range(n_layers):                    # static unroll (L = 5)
        src = bufs[layer % 2]
        dst = bufs[(layer + 1) % 2]
        cin, cout = cps[layer], cps[layer + 1]

        # K accumulating MXU dots (no im2col temporary).  All slice starts are
        # static Python ints, so no pl.multiple_of hints are needed.
        acc = None
        for k in range(K):
            r0 = halo - pad + k
            xs = src[r0:r0 + T, :cin]                           # (T, cin)
            d = jnp.dot(xs, w_refs[layer][k],
                        preferred_element_type=jnp.float32)     # (T, cout) f32
            acc = d if acc is None else acc + d
        acc = acc + b_refs[layer][...]                           # f32 bias add

        if layer < n_layers - 1:
            acc = jnp.tanh(acc)                                  # EUP, f32
            dst[halo:halo + T, :cout] = acc.astype(dst.dtype)    # aligned store
        else:
            o_ref[0] = acc.astype(o_ref.dtype)


# ----------------------------------------------------------------------------
# Parameter construction (deterministic) + BN folding (glue, plain JAX)
# ----------------------------------------------------------------------------
def make_postnet_params(key, n_mel, emb_dims, n_convs, kernel_size):
    """Returns a list of per-layer dicts with conv + batchnorm params."""
    channels = [n_mel] + list(emb_dims[:n_convs - 1]) + [n_mel]
    params = []
    for i in range(n_convs):
        c_in, c_out = channels[i], channels[i + 1]
        key, kw, kb, km, kv = jax.random.split(key, 5)
        limit = sqrt(6.0 / (c_in * kernel_size + c_out * kernel_size))
        w = jax.random.uniform(kw, (c_out, c_in, kernel_size),
                               minval=-limit, maxval=limit, dtype=jnp.float32)
        b = jax.random.uniform(kb, (c_out,), minval=-0.1, maxval=0.1,
                               dtype=jnp.float32)
        gamma = 1.0 + 0.1 * jax.random.normal(km, (c_out,), dtype=jnp.float32)
        beta = 0.1 * jax.random.normal(kv, (c_out,), dtype=jnp.float32)
        running_mean = 0.05 * jnp.arange(c_out, dtype=jnp.float32)
        running_var = 1.0 + 0.01 * jnp.arange(c_out, dtype=jnp.float32)
        params.append(dict(w=w, b=b, gamma=gamma, beta=beta,
                           mean=running_mean, var=running_var))
    return params


def fold_bn(layer, eps=1e-5):
    """Fold eval-mode BatchNorm1d into the conv weight/bias.
    Returns (w_kio, bias) with w in (K, C_in, C_out) layout."""
    w, b = layer["w"], layer["b"]                  # (C_out, C_in, K), (C_out,)
    scale = layer["gamma"] / jnp.sqrt(layer["var"] + eps)      # (C_out,)
    w_f = w * scale[:, None, None]
    b_f = (b - layer["mean"]) * scale + layer["beta"]
    w_kio = jnp.transpose(w_f, (2, 1, 0))          # (K, C_in, C_out)
    return w_kio, b_f


# ----------------------------------------------------------------------------
# Wrapper: fold + per-layer pad params once, single fused pallas_call over batch.
# ----------------------------------------------------------------------------
def postnet_forward(x_nct, params, *, compute_dtype=jnp.bfloat16):
    """x_nct: (B, C, T) like PyTorch; returns (B, C, T) float32.

    Note: the default compute path is bf16 weights/activations with f32 MXU
    accumulation (validated at atol/rtol=5e-2 vs the f32 reference); pass
    compute_dtype=jnp.float32 for tight-tolerance execution.
    """
    B, C0, T = x_nct.shape
    n_layers = len(params)
    K = params[0]["w"].shape[-1]
    assert K % 2 == 1, "pad=(K-1)//2 matches 'same' only for odd kernel sizes"
    pad = (K - 1) // 2

    # Per-layer padded channel widths (each a multiple of 128, lane dense).
    channels = [params[0]["w"].shape[1]] + [p["w"].shape[0] for p in params]
    cps = tuple(_round_up(c, 128) for c in channels)
    cmax = max(cps)

    # Fold eval-mode BN; zero-pad each layer's weights/bias to its own padded
    # widths.  Padded rows/cols/bias are exactly zero, so padded channels stay
    # zero through tanh and never leak into real channels.
    w_list, b_list = [], []
    for i, p in enumerate(params):
        w_kio, b_f = fold_bn(p)                    # (K, c_in, c_out), (c_out,)
        _, c_in, c_out = w_kio.shape
        w_pad = jnp.zeros((K, cps[i], cps[i + 1]), jnp.float32)
        w_pad = w_pad.at[:, :c_in, :c_out].set(w_kio)
        w_list.append(w_pad.astype(compute_dtype))
        b_list.append(jnp.zeros((1, cps[i + 1]), jnp.float32).at[0, :c_out].set(b_f))

    # One NCT -> NTC transpose + channel pad + cast per call (not per layer).
    x_btc = jnp.transpose(x_nct, (0, 2, 1))
    x_btc = jnp.pad(x_btc, ((0, 0), (0, 0), (0, cps[0] - C0))).astype(compute_dtype)

    halo = 8                                       # sublane-aligned top halo (>= pad)
    assert halo >= pad
    T_scr = _round_up(halo + T + pad, 8)

    kernel = functools.partial(postnet_fused_kernel, K=K, T=T, halo=halo,
                               n_layers=n_layers, cps=cps)

    # Weights / biases: constant index map -> fetched once, single-buffered.
    const3 = lambda b: (0, 0, 0)
    const2 = lambda b: (0, 0)
    w_specs = [pl.BlockSpec((K, cps[i], cps[i + 1]), const3,
                            pipeline_mode=pl.Buffered(1)) for i in range(n_layers)]
    b_specs = [pl.BlockSpec((1, cps[i + 1]), const2,
                            pipeline_mode=pl.Buffered(1)) for i in range(n_layers)]

    itemsize = jnp.dtype(compute_dtype).itemsize
    cost = pl.CostEstimate(
        flops=2 * B * T * sum(K * cps[i] * cps[i + 1] for i in range(n_layers)),
        transcendentals=B * T * sum(cps[1:n_layers]),
        bytes_accessed=(x_btc.size * itemsize
                        + sum(int(w.size) for w in w_list) * itemsize
                        + sum(int(b.size) for b in b_list) * 4
                        + B * T * cps[-1] * 4),
    )

    out_padded = pl.pallas_call(
        kernel,
        out_shape=jax.ShapeDtypeStruct((B, T, cps[-1]), jnp.float32),
        grid_spec=pltpu.PrefetchScalarGridSpec(
            num_scalar_prefetch=0,
            grid=(B,),
            in_specs=[pl.BlockSpec((1, T, cps[0]), lambda b: (b, 0, 0))]
                     + w_specs + b_specs,
            out_specs=pl.BlockSpec((1, T, cps[-1]), lambda b: (b, 0, 0)),
            scratch_shapes=[
                pltpu.VMEM((T_scr, cmax), compute_dtype),   # ping
                pltpu.VMEM((T_scr, cmax), compute_dtype),   # pong
            ],
        ),
        compiler_params=pltpu.CompilerParams(
            dimension_semantics=("parallel",),
            vmem_limit_bytes=_pick_vmem_limit(),
        ),
        cost_estimate=cost,
    )(x_btc, *w_list, *b_list)

    out = out_padded[:, :, :C0]                    # drop channel padding
    return jnp.transpose(out, (0, 2, 1))           # -> (B, C, T)


# ----------------------------------------------------------------------------
# Plain-JAX reference for verification (f32)
# ----------------------------------------------------------------------------
def postnet_reference(x_nct, params):
    x = x_nct
    n = len(params)
    for i, layer in enumerate(params):
        w_kio, b_f = fold_bn(layer)
        w_oik = jnp.transpose(w_kio, (2, 1, 0))    # (C_out, C_in, K)
        y = jax.lax.conv_general_dilated(
            x, w_oik, window_strides=(1,), padding="SAME",
            dimension_numbers=("NCH", "OIH", "NCH"))
        y = y + b_f[None, :, None]
        if i < n - 1:
            y = jnp.tanh(y)
        x = y
    return x


if __name__ == "__main__":
    # Small synthetic hparams.
    n_mel_channels = 8
    postnet_embedding_dims = [32, 32, 32, 32]
    postnet_n_convolutions = 5
    postnet_kernel_size = 5
    B, T = 2, 16

    key = jax.random.PRNGKey(0)
    kx, kp = jax.random.split(key)
    x = jax.random.normal(kx, (B, n_mel_channels, T), dtype=jnp.float32)

    params = make_postnet_params(kp, n_mel_channels, postnet_embedding_dims,
                                 postnet_n_convolutions, postnet_kernel_size)

    ref = postnet_reference(x, params)

    # f32 compute path: validates the fused-kernel structure at tight tolerance.
    out_f32 = jax.block_until_ready(
        postnet_forward(x, params, compute_dtype=jnp.float32))
    assert out_f32.shape == (B, n_mel_channels, T)
    assert jnp.allclose(out_f32, ref, atol=1e-4, rtol=1e-4), "f32 mismatch vs reference"

    # bf16 compute path (default fast path): f32 accumulation, looser tolerance.
    out_bf16 = jax.block_until_ready(postnet_forward(x, params))
    assert out_bf16.shape == (B, n_mel_channels, T)
    assert jnp.allclose(out_bf16, ref, atol=5e-2, rtol=5e-2), "bf16 mismatch vs reference"

    print("KERNEL_OK")
</pallas_src>

<mosaic_0001>
module attributes {stable_mosaic.version = 11 : i64} {
  func.func @postnet_fused_kernel(%arg0: i32, %arg1: memref<1x16x128xf32, #tpu.memory_space<vmem>>, %arg2: memref<5x128x128xf32, #tpu.memory_space<vmem>>, %arg3: memref<5x128x128xf32, #tpu.memory_space<vmem>>, %arg4: memref<5x128x128xf32, #tpu.memory_space<vmem>>, %arg5: memref<5x128x128xf32, #tpu.memory_space<vmem>>, %arg6: memref<5x128x128xf32, #tpu.memory_space<vmem>>, %arg7: memref<1x128xf32, #tpu.memory_space<vmem>>, %arg8: memref<1x128xf32, #tpu.memory_space<vmem>>, %arg9: memref<1x128xf32, #tpu.memory_space<vmem>>, %arg10: memref<1x128xf32, #tpu.memory_space<vmem>>, %arg11: memref<1x128xf32, #tpu.memory_space<vmem>>, %arg12: memref<1x16x128xf32, #tpu.memory_space<vmem>>, %arg13: memref<32x128xf32, #tpu.memory_space<vmem>>, %arg14: memref<32x128xf32, #tpu.memory_space<vmem>>) attributes {dimension_semantics = [#tpu.dimension_semantics<parallel>], iteration_bounds = array<i64: 2>, scalar_prefetch = 0 : i64, scratch_operands = 2 : i64, tpu.core_type = #tpu.core_type<tc>, window_params = [{transform_indices = @transform_0, window_bounds = array<i64: 1, 16, 128>}, {pipeline_mode = #tpu.pipeline_mode<synchronous>, transform_indices = @transform_1, window_bounds = array<i64: 5, 128, 128>}, {pipeline_mode = #tpu.pipeline_mode<synchronous>, transform_indices = @transform_2, window_bounds = array<i64: 5, 128, 128>}, {pipeline_mode = #tpu.pipeline_mode<synchronous>, transform_indices = @transform_3, window_bounds = array<i64: 5, 128, 128>}, {pipeline_mode = #tpu.pipeline_mode<synchronous>, transform_indices = @transform_4, window_bounds = array<i64: 5, 128, 128>}, {pipeline_mode = #tpu.pipeline_mode<synchronous>, transform_indices = @transform_5, window_bounds = array<i64: 5, 128, 128>}, {pipeline_mode = #tpu.pipeline_mode<synchronous>, transform_indices = @transform_6, window_bounds = array<i64: 1, 128>}, {pipeline_mode = #tpu.pipeline_mode<synchronous>, transform_indices = @transform_7, window_bounds = array<i64: 1, 128>}, {pipeline_mode = #tpu.pipeline_mode<synchronous>, transform_indices = @transform_8, window_bounds = array<i64: 1, 128>}, {pipeline_mode = #tpu.pipeline_mode<synchronous>, transform_indices = @transform_9, window_bounds = array<i64: 1, 128>}, {pipeline_mode = #tpu.pipeline_mode<synchronous>, transform_indices = @transform_10, window_bounds = array<i64: 1, 128>}, {transform_indices = @transform_11, window_bounds = array<i64: 1, 16, 128>}]} {
    %cst = arith.constant 0.000000e+00 : f32
    %0 = vector.broadcast %cst : f32 to vector<2x128xf32>
    %c6 = arith.constant 6 : index
    %c0 = arith.constant 0 : index
    %1 = vector.load %arg13[%c6, %c0] : memref<32x128xf32, #tpu.memory_space<vmem>>, vector<2x128xf32>
    tpu.vector_store %arg13[%c6, %c0], %0 {strides = array<i32>} : memref<32x128xf32, #tpu.memory_space<vmem>>, vector<2x128xf32>,
    %c24 = arith.constant 24 : index
    %c0_0 = arith.constant 0 : index
    %2 = vector.load %arg13[%c24, %c0_0] : memref<32x128xf32, #tpu.memory_space<vmem>>, vector<2x128xf32>
    tpu.vector_store %arg13[%c24, %c0_0], %0 {strides = array<i32>} : memref<32x128xf32, #tpu.memory_space<vmem>>, vector<2x128xf32>,
    %c6_1 = arith.constant 6 : index
    %c0_2 = arith.constant 0 : index
    %3 = vector.load %arg14[%c6_1, %c0_2] : memref<32x128xf32, #tpu.memory_space<vmem>>, vector<2x128xf32>
    tpu.vector_store %arg14[%c6_1, %c0_2], %0 {strides = array<i32>} : memref<32x128xf32, #tpu.memory_space<vmem>>, vector<2x128xf32>,
    %c24_3 = arith.constant 24 : index
    %c0_4 = arith.constant 0 : index
    %4 = vector.load %arg14[%c24_3, %c0_4] : memref<32x128xf32, #tpu.memory_space<vmem>>, vector<2x128xf32>
    tpu.vector_store %arg14[%c24_3, %c0_4], %0 {strides = array<i32>} : memref<32x128xf32, #tpu.memory_space<vmem>>, vector<2x128xf32>,
    %c0_5 = arith.constant 0 : index
    %c0_6 = arith.constant 0 : index
    %c0_7 = arith.constant 0 : index
    %5 = vector.load %arg1[%c0_5, %c0_6, %c0_7] : memref<1x16x128xf32, #tpu.memory_space<vmem>>, vector<1x16x128xf32>
    %6 = vector.shape_cast %5 : vector<1x16x128xf32> to vector<16x128xf32>
    %c8 = arith.constant 8 : index
    %c0_8 = arith.constant 0 : index
    %7 = vector.load %arg13[%c8, %c0_8] : memref<32x128xf32, #tpu.memory_space<vmem>>, vector<16x128xf32>
    tpu.vector_store %arg13[%c8, %c0_8], %6 {strides = array<i32>} : memref<32x128xf32, #tpu.memory_space<vmem>>, vector<16x128xf32>,
    %c6_9 = arith.constant 6 : index
    %c0_10 = arith.constant 0 : index
    %8 = vector.load %arg13[%c6_9, %c0_10] : memref<32x128xf32, #tpu.memory_space<vmem>>, vector<16x128xf32>
    %c0_11 = arith.constant 0 : index
    %c0_12 = arith.constant 0 : index
    %c0_13 = arith.constant 0 : index
    %9 = vector.load %arg2[%c0_11, %c0_12, %c0_13] : memref<5x128x128xf32, #tpu.memory_space<vmem>>, vector<1x128x128xf32>
    %10 = vector.shape_cast %9 : vector<1x128x128xf32> to vector<128x128xf32>
    %cst_14 = arith.constant dense<0.000000e+00> : vector<16x128xf32>
    %11 = tpu.matmul %8, %10, %cst_14 {dimension_numbers = #tpu.dot_dimension_numbers<[1], [0], [0], [1], [0, 0, 1, 1], [], []>} : vector<16x128xf32>, vector<128x128xf32>, vector<16x128xf32> -> vector<16x128xf32>
    %c7 = arith.constant 7 : index
    %c0_15 = arith.constant 0 : index
    %12 = vector.load %arg13[%c7, %c0_15] : memref<32x128xf32, #tpu.memory_space<vmem>>, vector<16x128xf32>
    %c1 = arith.constant 1 : index
    %c0_16 = arith.constant 0 : index
    %c0_17 = arith.constant 0 : index
    %13 = vector.load %arg2[%c1, %c0_16, %c0_17] : memref<5x128x128xf32, #tpu.memory_space<vmem>>, vector<1x128x128xf32>
    %14 = vector.shape_cast %13 : vector<1x128x128xf32> to vector<128x128xf32>
    %cst_18 = arith.constant dense<0.000000e+00> : vector<16x128xf32>
    %15 = tpu.matmul %12, %14, %cst_18 {dimension_numbers = #tpu.dot_dimension_numbers<[1], [0], [0], [1], [0, 0, 1, 1], [], []>} : vector<16x128xf32>, vector<128x128xf32>, vector<16x128xf32> -> vector<16x128xf32>
    %16 = arith.addf %11, %15 : vector<16x128xf32>
    %c8_19 = arith.constant 8 : index
    %c0_20 = arith.constant 0 : index
    %17 = vector.load %arg13[%c8_19, %c0_20] : memref<32x128xf32, #tpu.memory_space<vmem>>, vector<16x128xf32>
    %c2 = arith.constant 2 : index
    %c0_21 = arith.constant 0 : index
    %c0_22 = arith.constant 0 : index
    %18 = vector.load %arg2[%c2, %c0_21, %c0_22] : memref<5x128x128xf32, #tpu.memory_space<vmem>>, vector<1x128x128xf32>
    %19 = vector.shape_cast %18 : vector<1x128x128xf32> to vector<128x128xf32>
    %cst_23 = arith.constant dense<0.000000e+00> : vector<16x128xf32>
    %20 = tpu.matmul %17, %19, %cst_23 {dimension_numbers = #tpu.dot_dimension_numbers<[1], [0], [0], [1], [0, 0, 1, 1], [], []>} : vector<16x128xf32>, vector<128x128xf32>, vector<16x128xf32> -> vector<16x128xf32>
    %21 = arith.addf %16, %20 : vector<16x128xf32>
    %c9 = arith.constant 9 : index
    %c0_24 = arith.constant 0 : index
    %22 = vector.load %arg13[%c9, %c0_24] : memref<32x128xf32, #tpu.memory_space<vmem>>, vector<16x128xf32>
    %c3 = arith.constant 3 : index
    %c0_25 = arith.constant 0 : index
    %c0_26 = arith.constant 0 : index
    %23 = vector.load %arg2[%c3, %c0_25, %c0_26] : memref<5x128x128xf32, #tpu.memory_space<vmem>>, vector<1x128x128xf32>
    %24 = vector.shape_cast %23 : vector<1x128x128xf32> to vector<128x128xf32>
    %cst_27 = arith.constant dense<0.000000e+00> : vector<16x128xf32>
    %25 = tpu.matmul %22, %24, %cst_27 {dimension_numbers = #tpu.dot_dimension_numbers<[1], [0], [0], [1], [0, 0, 1, 1], [], []>} : vector<16x128xf32>, vector<128x128xf32>, vector<16x128xf32> -> vector<16x128xf32>
    %26 = arith.addf %21, %25 : vector<16x128xf32>
    %c10 = arith.constant 10 : index
    %c0_28 = arith.constant 0 : index
    %27 = vector.load %arg13[%c10, %c0_28] : memref<32x128xf32, #tpu.memory_space<vmem>>, vector<16x128xf32>
    %c4 = arith.constant 4 : index
    %c0_29 = arith.constant 0 : index
    %c0_30 = arith.constant 0 : index
    %28 = vector.load %arg2[%c4, %c0_29, %c0_30] : memref<5x128x128xf32, #tpu.memory_space<vmem>>, vector<1x128x128xf32>
    %29 = vector.shape_cast %28 : vector<1x128x128xf32> to vector<128x128xf32>
    %cst_31 = arith.constant dense<0.000000e+00> : vector<16x128xf32>
    %30 = tpu.matmul %27, %29, %cst_31 {dimension_numbers = #tpu.dot_dimension_numbers<[1], [0], [0], [1], [0, 0, 1, 1], [], []>} : vector<16x128xf32>, vector<128x128xf32>, vector<16x128xf32> -> vector<16x128xf32>
    %31 = arith.addf %26, %30 : vector<16x128xf32>
    %c0_32 = arith.constant 0 : index
    %c0_33 = arith.constant 0 : index
    %32 = vector.load %arg7[%c0_32, %c0_33] : memref<1x128xf32, #tpu.memory_space<vmem>>, vector<1x128xf32>
    %33 = vector.broadcast %32 : vector<1x128xf32> to vector<16x128xf32>
    %34 = arith.addf %31, %33 : vector<16x128xf32>
    %35 = math.tanh %34 : vector<16x128xf32>
    %c8_34 = arith.constant 8 : index
    %c0_35 = arith.constant 0 : index
    %36 = vector.load %arg14[%c8_34, %c0_35] : memref<32x128xf32, #tpu.memory_space<vmem>>, vector<16x128xf32>
    tpu.vector_store %arg14[%c8_34, %c0_35], %35 {strides = array<i32>} : memref<32x128xf32, #tpu.memory_space<vmem>>, vector<16x128xf32>,
    %c6_36 = arith.constant 6 : index
    %c0_37 = arith.constant 0 : index
    %37 = vector.load %arg14[%c6_36, %c0_37] : memref<32x128xf32, #tpu.memory_space<vmem>>, vector<16x128xf32>
    %c0_38 = arith.constant 0 : index
    %c0_39 = arith.constant 0 : index
    %c0_40 = arith.constant 0 : index
    %38 = vector.load %arg3[%c0_38, %c0_39, %c0_40] : memref<5x128x128xf32, #tpu.memory_space<vmem>>, vector<1x128x128xf32>
    %39 = vector.shape_cast %38 : vector<1x128x128xf32> to vector<128x128xf32>
    %cst_41 = arith.constant dense<0.000000e+00> : vector<16x128xf32>
    %40 = tpu.matmul %37, %39, %cst_41 {dimension_numbers = #tpu.dot_dimension_numbers<[1], [0], [0], [1], [0, 0, 1, 1], [], []>} : vector<16x128xf32>, vector<128x128xf32>, vector<16x128xf32> -> vector<16x128xf32>
    %c7_42 = arith.constant 7 : index
    %c0_43 = arith.constant 0 : index
    %41 = vector.load %arg14[%c7_42, %c0_43] : memref<32x128xf32, #tpu.memory_space<vmem>>, vector<16x128xf32>
    %c1_44 = arith.constant 1 : index
    %c0_45 = arith.constant 0 : index
    %c0_46 = arith.constant 0 : index
    %42 = vector.load %arg3[%c1_44, %c0_45, %c0_46] : memref<5x128x128xf32, #tpu.memory_space<vmem>>, vector<1x128x128xf32>
    %43 = vector.shape_cast %42 : vector<1x128x128xf32> to vector<128x128xf32>
    %cst_47 = arith.constant dense<0.000000e+00> : vector<16x128xf32>
    %44 = tpu.matmul %41, %43, %cst_47 {dimension_numbers = #tpu.dot_dimension_numbers<[1], [0], [0], [1], [0, 0, 1, 1], [], []>} : vector<16x128xf32>, vector<128x128xf32>, vector<16x128xf32> -> vector<16x128xf32>
    %45 = arith.addf %40, %44 : vector<16x128xf32>
    %c8_48 = arith.constant 8 : index
    %c0_49 = arith.constant 0 : index
    %46 = vector.load %arg14[%c8_48, %c0_49] : memref<32x128xf32, #tpu.memory_space<vmem>>, vector<16x128xf32>
    %c2_50 = arith.constant 2 : index
    %c0_51 = arith.constant 0 : index
    %c0_52 = arith.constant 0 : index
    %47 = vector.load %arg3[%c2_50, %c0_51, %c0_52] : memref<5x128x128xf32, #tpu.memory_space<vmem>>, vector<1x128x128xf32>
    %48 = vector.shape_cast %47 : vector<1x128x128xf32> to vector<128x128xf32>
    %cst_53 = arith.constant dense<0.000000e+00> : vector<16x128xf32>
    %49 = tpu.matmul %46, %48, %cst_53 {dimension_numbers = #tpu.dot_dimension_numbers<[1], [0], [0], [1], [0, 0, 1, 1], [], []>} : vector<16x128xf32>, vector<128x128xf32>, vector<16x128xf32> -> vector<16x128xf32>
    %50 = arith.addf %45, %49 : vector<16x128xf32>
    %c9_54 = arith.constant 9 : index
    %c0_55 = arith.constant 0 : index
    %51 = vector.load %arg14[%c9_54, %c0_55] : memref<32x128xf32, #tpu.memory_space<vmem>>, vector<16x128xf32>
    %c3_56 = arith.constant 3 : index
    %c0_57 = arith.constant 0 : index
    %c0_58 = arith.constant 0 : index
    %52 = vector.load %arg3[%c3_56, %c0_57, %c0_58] : memref<5x128x128xf32, #tpu.memory_space<vmem>>, vector<1x128x128xf32>
    %53 = vector.shape_cast %52 : vector<1x128x128xf32> to vector<128x128xf32>
    %cst_59 = arith.constant dense<0.000000e+00> : vector<16x128xf32>
    %54 = tpu.matmul %51, %53, %cst_59 {dimension_numbers = #tpu.dot_dimension_numbers<[1], [0], [0], [1], [0, 0, 1, 1], [], []>} : vector<16x128xf32>, vector<128x128xf32>, vector<16x128xf32> -> vector<16x128xf32>
    %55 = arith.addf %50, %54 : vector<16x128xf32>
    %c10_60 = arith.constant 10 : index
    %c0_61 = arith.constant 0 : index
    %56 = vector.load %arg14[%c10_60, %c0_61] : memref<32x128xf32, #tpu.memory_space<vmem>>, vector<16x128xf32>
    %c4_62 = arith.constant 4 : index
    %c0_63 = arith.constant 0 : index
    %c0_64 = arith.constant 0 : index
    %57 = vector.load %arg3[%c4_62, %c0_63, %c0_64] : memref<5x128x128xf32, #tpu.memory_space<vmem>>, vector<1x128x128xf32>
    %58 = vector.shape_cast %57 : vector<1x128x128xf32> to vector<128x128xf32>
    %cst_65 = arith.constant dense<0.000000e+00> : vector<16x128xf32>
    %59 = tpu.matmul %56, %58, %cst_65 {dimension_numbers = #tpu.dot_dimension_numbers<[1], [0], [0], [1], [0, 0, 1, 1], [], []>} : vector<16x128xf32>, vector<128x128xf32>, vector<16x128xf32> -> vector<16x128xf32>
    %60 = arith.addf %55, %59 : vector<16x128xf32>
    %c0_66 = arith.constant 0 : index
    %c0_67 = arith.constant 0 : index
    %61 = vector.load %arg8[%c0_66, %c0_67] : memref<1x128xf32, #tpu.memory_space<vmem>>, vector<1x128xf32>
    %62 = vector.broadcast %61 : vector<1x128xf32> to vector<16x128xf32>
    %63 = arith.addf %60, %62 : vector<16x128xf32>
    %64 = math.tanh %63 : vector<16x128xf32>
    %c8_68 = arith.constant 8 : index
    %c0_69 = arith.constant 0 : index
    %65 = vector.load %arg13[%c8_68, %c0_69] : memref<32x128xf32, #tpu.memory_space<vmem>>, vector<16x128xf32>
    tpu.vector_store %arg13[%c8_68, %c0_69], %64 {strides = array<i32>} : memref<32x128xf32, #tpu.memory_space<vmem>>, vector<16x128xf32>,
    %c6_70 = arith.constant 6 : index
    %c0_71 = arith.constant 0 : index
    %66 = vector.load %arg13[%c6_70, %c0_71] : memref<32x128xf32, #tpu.memory_space<vmem>>, vector<16x128xf32>
    %c0_72 = arith.constant 0 : index
    %c0_73 = arith.constant 0 : index
    %c0_74 = arith.constant 0 : index
    %67 = vector.load %arg4[%c0_72, %c0_73, %c0_74] : memref<5x128x128xf32, #tpu.memory_space<vmem>>, vector<1x128x128xf32>
    %68 = vector.shape_cast %67 : vector<1x128x128xf32> to vector<128x128xf32>
    %cst_75 = arith.constant dense<0.000000e+00> : vector<16x128xf32>
    %69 = tpu.matmul %66, %68, %cst_75 {dimension_numbers = #tpu.dot_dimension_numbers<[1], [0], [0], [1], [0, 0, 1, 1], [], []>} : vector<16x128xf32>, vector<128x128xf32>, vector<16x128xf32> -> vector<16x128xf32>
    %c7_76 = arith.constant 7 : index
    %c0_77 = arith.constant 0 : index
    %70 = vector.load %arg13[%c7_76, %c0_77] : memref<32x128xf32, #tpu.memory_space<vmem>>, vector<16x128xf32>
    %c1_78 = arith.constant 1 : index
    %c0_79 = arith.constant 0 : index
    %c0_80 = arith.constant 0 : index
    %71 = vector.load %arg4[%c1_78, %c0_79, %c0_80] : memref<5x128x128xf32, #tpu.memory_space<vmem>>, vector<1x128x128xf32>
    %72 = vector.shape_cast %71 : vector<1x128x128xf32> to vector<128x128xf32>
    %cst_81 = arith.constant dense<0.000000e+00> : vector<16x128xf32>
    %73 = tpu.matmul %70, %72, %cst_81 {dimension_numbers = #tpu.dot_dimension_numbers<[1], [0], [0], [1], [0, 0, 1, 1], [], []>} : vector<16x128xf32>, vector<128x128xf32>, vector<16x128xf32> -> vector<16x128xf32>
    %74 = arith.addf %69, %73 : vector<16x128xf32>
    %c8_82 = arith.constant 8 : index
    %c0_83 = arith.constant 0 : index
    %75 = vector.load %arg13[%c8_82, %c0_83] : memref<32x128xf32, #tpu.memory_space<vmem>>, vector<16x128xf32>
    %c2_84 = arith.constant 2 : index
    %c0_85 = arith.constant 0 : index
    %c0_86 = arith.constant 0 : index
    %76 = vector.load %arg4[%c2_84, %c0_85, %c0_86] : memref<5x128x128xf32, #tpu.memory_space<vmem>>, vector<1x128x128xf32>
    %77 = vector.shape_cast %76 : vector<1x128x128xf32> to vector<128x128xf32>
    %cst_87 = arith.constant dense<0.000000e+00> : vector<16x128xf32>
    %78 = tpu.matmul %75, %77, %cst_87 {dimension_numbers = #tpu.dot_dimension_numbers<[1], [0], [0], [1], [0, 0, 1, 1], [], []>} : vector<16x128xf32>, vector<128x128xf32>, vector<16x128xf32> -> vector<16x128xf32>
    %79 = arith.addf %74, %78 : vector<16x128xf32>
    %c9_88 = arith.constant 9 : index
    %c0_89 = arith.constant 0 : index
    %80 = vector.load %arg13[%c9_88, %c0_89] : memref<32x128xf32, #tpu.memory_space<vmem>>, vector<16x128xf32>
    %c3_90 = arith.constant 3 : index
    %c0_91 = arith.constant 0 : index
    %c0_92 = arith.constant 0 : index
    %81 = vector.load %arg4[%c3_90, %c0_91, %c0_92] : memref<5x128x128xf32, #tpu.memory_space<vmem>>, vector<1x128x128xf32>
    %82 = vector.shape_cast %81 : vector<1x128x128xf32> to vector<128x128xf32>
    %cst_93 = arith.constant dense<0.000000e+00> : vector<16x128xf32>
    %83 = tpu.matmul %80, %82, %cst_93 {dimension_numbers = #tpu.dot_dimension_numbers<[1], [0], [0], [1], [0, 0, 1, 1], [], []>} : vector<16x128xf32>, vector<128x128xf32>, vector<16x128xf32> -> vector<16x128xf32>
    %84 = arith.addf %79, %83 : vector<16x128xf32>
    %c10_94 = arith.constant 10 : index
    %c0_95 = arith.constant 0 : index
    %85 = vector.load %arg13[%c10_94, %c0_95] : memref<32x128xf32, #tpu.memory_space<vmem>>, vector<16x128xf32>
    %c4_96 = arith.constant 4 : index
    %c0_97 = arith.constant 0 : index
    %c0_98 = arith.constant 0 : index
    %86 = vector.load %arg4[%c4_96, %c0_97, %c0_98] : memref<5x128x128xf32, #tpu.memory_space<vmem>>, vector<1x128x128xf32>
    %87 = vector.shape_cast %86 : vector<1x128x128xf32> to vector<128x128xf32>
    %cst_99 = arith.constant dense<0.000000e+00> : vector<16x128xf32>
    %88 = tpu.matmul %85, %87, %cst_99 {dimension_numbers = #tpu.dot_dimension_numbers<[1], [0], [0], [1], [0, 0, 1, 1], [], []>} : vector<16x128xf32>, vector<128x128xf32>, vector<16x128xf32> -> vector<16x128xf32>
    %89 = arith.addf %84, %88 : vector<16x128xf32>
    %c0_100 = arith.constant 0 : index
    %c0_101 = arith.constant 0 : index
    %90 = vector.load %arg9[%c0_100, %c0_101] : memref<1x128xf32, #tpu.memory_space<vmem>>, vector<1x128xf32>
    %91 = vector.broadcast %90 : vector<1x128xf32> to vector<16x128xf32>
    %92 = arith.addf %89, %91 : vector<16x128xf32>
    %93 = math.tanh %92 : vector<16x128xf32>
    %c8_102 = arith.constant 8 : index
    %c0_103 = arith.constant 0 : index
    %94 = vector.load %arg14[%c8_102, %c0_103] : memref<32x128xf32, #tpu.memory_space<vmem>>, vector<16x128xf32>
    tpu.vector_store %arg14[%c8_102, %c0_103], %93 {strides = array<i32>} : memref<32x128xf32, #tpu.memory_space<vmem>>, vector<16x128xf32>,
    %c6_104 = arith.constant 6 : index
    %c0_105 = arith.constant 0 : index
    %95 = vector.load %arg14[%c6_104, %c0_105] : memref<32x128xf32, #tpu.memory_space<vmem>>, vector<16x128xf32>
    %c0_106 = arith.constant 0 : index
    %c0_107 = arith.constant 0 : index
    %c0_108 = arith.constant 0 : index
    %96 = vector.load %arg5[%c0_106, %c0_107, %c0_108] : memref<5x128x128xf32, #tpu.memory_space<vmem>>, vector<1x128x128xf32>
    %97 = vector.shape_cast %96 : vector<1x128x128xf32> to vector<128x128xf32>
    %cst_109 = arith.constant dense<0.000000e+00> : vector<16x128xf32>
    %98 = tpu.matmul %95, %97, %cst_109 {dimension_numbers = #tpu.dot_dimension_numbers<[1], [0], [0], [1], [0, 0, 1, 1], [], []>} : vector<16x128xf32>, vector<128x128xf32>, vector<16x128xf32> -> vector<16x128xf32>
    %c7_110 = arith.constant 7 : index
    %c0_111 = arith.constant 0 : index
    %99 = vector.load %arg14[%c7_110, %c0_111] : memref<32x128xf32, #tpu.memory_space<vmem>>, vector<16x128xf32>
    %c1_112 = arith.constant 1 : index
    %c0_113 = arith.constant 0 : index
    %c0_114 = arith.constant 0 : index
    %100 = vector.load %arg5[%c1_112, %c0_113, %c0_114] : memref<5x128x128xf32, #tpu.memory_space<vmem>>, vector<1x128x128xf32>
    %101 = vector.shape_cast %100 : vector<1x128x128xf32> to vector<128x128xf32>
    %cst_115 = arith.constant dense<0.000000e+00> : vector<16x128xf32>
    %102 = tpu.matmul %99, %101, %cst_115 {dimension_numbers = #tpu.dot_dimension_numbers<[1], [0], [0], [1], [0, 0, 1, 1], [], []>} : vector<16x128xf32>, vector<128x128xf32>, vector<16x128xf32> -> vector<16x128xf32>
    %103 = arith.addf %98, %102 : vector<16x128xf32>
    %c8_116 = arith.constant 8 : index
    %c0_117 = arith.constant 0 : index
    %104 = vector.load %arg14[%c8_116, %c0_117] : memref<32x128xf32, #tpu.memory_space<vmem>>, vector<16x128xf32>
    %c2_118 = arith.constant 2 : index
    %c0_119 = arith.constant 0 : index
    %c0_120 = arith.constant 0 : index
    %105 = vector.load %arg5[%c2_118, %c0_119, %c0_120] : memref<5x128x128xf32, #tpu.memory_space<vmem>>, vector<1x128x128xf32>
    %106 = vector.shape_cast %105 : vector<1x128x128xf32> to vector<128x128xf32>
    %cst_121 = arith.constant dense<0.000000e+00> : vector<16x128xf32>
    %107 = tpu.matmul %104, %106, %cst_121 {dimension_numbers = #tpu.dot_dimension_numbers<[1], [0], [0], [1], [0, 0, 1, 1], [], []>} : vector<16x128xf32>, vector<128x128xf32>, vector<16x128xf32> -> vector<16x128xf32>
    %108 = arith.addf %103, %107 : vector<16x128xf32>
    %c9_122 = arith.constant 9 : index
    %c0_123 = arith.constant 0 : index
    %109 = vector.load %arg14[%c9_122, %c0_123] : memref<32x128xf32, #tpu.memory_space<vmem>>, vector<16x128xf32>
    %c3_124 = arith.constant 3 : index
    %c0_125 = arith.constant 0 : index
    %c0_126 = arith.constant 0 : index
    %110 = vector.load %arg5[%c3_124, %c0_125, %c0_126] : memref<5x128x128xf32, #tpu.memory_space<vmem>>, vector<1x128x128xf32>
    %111 = vector.shape_cast %110 : vector<1x128x128xf32> to vector<128x128xf32>
    %cst_127 = arith.constant dense<0.000000e+00> : vector<16x128xf32>
    %112 = tpu.matmul %109, %111, %cst_127 {dimension_numbers = #tpu.dot_dimension_numbers<[1], [0], [0], [1], [0, 0, 1, 1], [], []>} : vector<16x128xf32>, vector<128x128xf32>, vector<16x128xf32> -> vector<16x128xf32>
    %113 = arith.addf %108, %112 : vector<16x128xf32>
    %c10_128 = arith.constant 10 : index
    %c0_129 = arith.constant 0 : index
    %114 = vector.load %arg14[%c10_128, %c0_129] : memref<32x128xf32, #tpu.memory_space<vmem>>, vector<16x128xf32>
    %c4_130 = arith.constant 4 : index
    %c0_131 = arith.constant 0 : index
    %c0_132 = arith.constant 0 : index
    %115 = vector.load %arg5[%c4_130, %c0_131, %c0_132] : memref<5x128x128xf32, #tpu.memory_space<vmem>>, vector<1x128x128xf32>
    %116 = vector.shape_cast %115 : vector<1x128x128xf32> to vector<128x128xf32>
    %cst_133 = arith.constant dense<0.000000e+00> : vector<16x128xf32>
    %117 = tpu.matmul %114, %116, %cst_133 {dimension_numbers = #tpu.dot_dimension_numbers<[1], [0], [0], [1], [0, 0, 1, 1], [], []>} : vector<16x128xf32>, vector<128x128xf32>, vector<16x128xf32> -> vector<16x128xf32>
    %118 = arith.addf %113, %117 : vector<16x128xf32>
    %c0_134 = arith.constant 0 : index
    %c0_135 = arith.constant 0 : index
    %119 = vector.load %arg10[%c0_134, %c0_135] : memref<1x128xf32, #tpu.memory_space<vmem>>, vector<1x128xf32>
    %120 = vector.broadcast %119 : vector<1x128xf32> to vector<16x128xf32>
    %121 = arith.addf %118, %120 : vector<16x128xf32>
    %122 = math.tanh %121 : vector<16x128xf32>
    %c8_136 = arith.constant 8 : index
    %c0_137 = arith.constant 0 : index
    %123 = vector.load %arg13[%c8_136, %c0_137] : memref<32x128xf32, #tpu.memory_space<vmem>>, vector<16x128xf32>
    tpu.vector_store %arg13[%c8_136, %c0_137], %122 {strides = array<i32>} : memref<32x128xf32, #tpu.memory_space<vmem>>, vector<16x128xf32>,
    %c6_138 = arith.constant 6 : index
    %c0_139 = arith.constant 0 : index
    %124 = vector.load %arg13[%c6_138, %c0_139] : memref<32x128xf32, #tpu.memory_space<vmem>>, vector<16x128xf32>
    %c0_140 = arith.constant 0 : index
    %c0_141 = arith.constant 0 : index
    %c0_142 = arith.constant 0 : index
    %125 = vector.load %arg6[%c0_140, %c0_141, %c0_142] : memref<5x128x128xf32, #tpu.memory_space<vmem>>, vector<1x128x128xf32>
    %126 = vector.shape_cast %125 : vector<1x128x128xf32> to vector<128x128xf32>
    %cst_143 = arith.constant dense<0.000000e+00> : vector<16x128xf32>
    %127 = tpu.matmul %124, %126, %cst_143 {dimension_numbers = #tpu.dot_dimension_numbers<[1], [0], [0], [1], [0, 0, 1, 1], [], []>} : vector<16x128xf32>, vector<128x128xf32>, vector<16x128xf32> -> vector<16x128xf32>
    %c7_144 = arith.constant 7 : index
    %c0_145 = arith.constant 0 : index
    %128 = vector.load %arg13[%c7_144, %c0_145] : memref<32x128xf32, #tpu.memory_space<vmem>>, vector<16x128xf32>
    %c1_146 = arith.constant 1 : index
    %c0_147 = arith.constant 0 : index
    %c0_148 = arith.constant 0 : index
    %129 = vector.load %arg6[%c1_146, %c0_147, %c0_148] : memref<5x128x128xf32, #tpu.memory_space<vmem>>, vector<1x128x128xf32>
    %130 = vector.shape_cast %129 : vector<1x128x128xf32> to vector<128x128xf32>
    %cst_149 = arith.constant dense<0.000000e+00> : vector<16x128xf32>
    %131 = tpu.matmul %128, %130, %cst_149 {dimension_numbers = #tpu.dot_dimension_numbers<[1], [0], [0], [1], [0, 0, 1, 1], [], []>} : vector<16x128xf32>, vector<128x128xf32>, vector<16x128xf32> -> vector<16x128xf32>
    %132 = arith.addf %127, %131 : vector<16x128xf32>
    %c8_150 = arith.constant 8 : index
    %c0_151 = arith.constant 0 : index
    %133 = vector.load %arg13[%c8_150, %c0_151] : memref<32x128xf32, #tpu.memory_space<vmem>>, vector<16x128xf32>
    %c2_152 = arith.constant 2 : index
    %c0_153 = arith.constant 0 : index
    %c0_154 = arith.constant 0 : index
    %134 = vector.load %arg6[%c2_152, %c0_153, %c0_154] : memref<5x128x128xf32, #tpu.memory_space<vmem>>, vector<1x128x128xf32>
    %135 = vector.shape_cast %134 : vector<1x128x128xf32> to vector<128x128xf32>
    %cst_155 = arith.constant dense<0.000000e+00> : vector<16x128xf32>
    %136 = tpu.matmul %133, %135, %cst_155 {dimension_numbers = #tpu.dot_dimension_numbers<[1], [0], [0], [1], [0, 0, 1, 1], [], []>} : vector<16x128xf32>, vector<128x128xf32>, vector<16x128xf32> -> vector<16x128xf32>
    %137 = arith.addf %132, %136 : vector<16x128xf32>
    %c9_156 = arith.constant 9 : index
    %c0_157 = arith.constant 0 : index
    %138 = vector.load %arg13[%c9_156, %c0_157] : memref<32x128xf32, #tpu.memory_space<vmem>>, vector<16x128xf32>
    %c3_158 = arith.constant 3 : index
    %c0_159 = arith.constant 0 : index
    %c0_160 = arith.constant 0 : index
    %139 = vector.load %arg6[%c3_158, %c0_159, %c0_160] : memref<5x128x128xf32, #tpu.memory_space<vmem>>, vector<1x128x128xf32>
    %140 = vector.shape_cast %139 : vector<1x128x128xf32> to vector<128x128xf32>
    %cst_161 = arith.constant dense<0.000000e+00> : vector<16x128xf32>
    %141 = tpu.matmul %138, %140, %cst_161 {dimension_numbers = #tpu.dot_dimension_numbers<[1], [0], [0], [1], [0, 0, 1, 1], [], []>} : vector<16x128xf32>, vector<128x128xf32>, vector<16x128xf32> -> vector<16x128xf32>
    %142 = arith.addf %137, %141 : vector<16x128xf32>
    %c10_162 = arith.constant 10 : index
    %c0_163 = arith.constant 0 : index
    %143 = vector.load %arg13[%c10_162, %c0_163] : memref<32x128xf32, #tpu.memory_space<vmem>>, vector<16x128xf32>
    %c4_164 = arith.constant 4 : index
    %c0_165 = arith.constant 0 : index
    %c0_166 = arith.constant 0 : index
    %144 = vector.load %arg6[%c4_164, %c0_165, %c0_166] : memref<5x128x128xf32, #tpu.memory_space<vmem>>, vector<1x128x128xf32>
    %145 = vector.shape_cast %144 : vector<1x128x128xf32> to vector<128x128xf32>
    %cst_167 = arith.constant dense<0.000000e+00> : vector<16x128xf32>
    %146 = tpu.matmul %143, %145, %cst_167 {dimension_numbers = #tpu.dot_dimension_numbers<[1], [0], [0], [1], [0, 0, 1, 1], [], []>} : vector<16x128xf32>, vector<128x128xf32>, vector<16x128xf32> -> vector<16x128xf32>
    %147 = arith.addf %142, %146 : vector<16x128xf32>
    %c0_168 = arith.constant 0 : index
    %c0_169 = arith.constant 0 : index
    %148 = vector.load %arg11[%c0_168, %c0_169] : memref<1x128xf32, #tpu.memory_space<vmem>>, vector<1x128xf32>
    %149 = vector.broadcast %148 : vector<1x128xf32> to vector<16x128xf32>
    %150 = arith.addf %147, %149 : vector<16x128xf32>
    %c0_170 = arith.constant 0 : index
    %c0_171 = arith.constant 0 : index
    %c0_172 = arith.constant 0 : index
    %151 = vector.load %arg12[%c0_170, %c0_171, %c0_172] : memref<1x16x128xf32, #tpu.memory_space<vmem>>, vector<1x16x128xf32>
    %152 = vector.shape_cast %151 : vector<1x16x128xf32> to vector<16x128xf32>
    %153 = vector.shape_cast %150 : vector<16x128xf32> to vector<1x16x128xf32>
    tpu.vector_store %arg12[%c0_170, %c0_171, %c0_172], %153 {strides = array<i32>} : memref<1x16x128xf32, #tpu.memory_space<vmem>>, vector<1x16x128xf32>,
    return
  }
  func.func @transform_0(%arg0: i32) -> (i32, i32, i32) {
    %c0_i32 = arith.constant 0 : i32
    %c0_i32_0 = arith.constant 0 : i32
    %c0_i32_1 = arith.constant 0 : i32
    return %arg0, %c0_i32, %c0_i32_0 : i32, i32, i32
  }
  func.func @transform_1(%arg0: i32) -> (i32, i32, i32) {
    %c0_i32 = arith.constant 0 : i32
    %c0_i32_0 = arith.constant 0 : i32
    %c0_i32_1 = arith.constant 0 : i32
    %c0_i32_2 = arith.constant 0 : i32
    return %c0_i32, %c0_i32_0, %c0_i32_1 : i32, i32, i32
  }
  func.func @transform_2(%arg0: i32) -> (i32, i32, i32) {
    %c0_i32 = arith.constant 0 : i32
    %c0_i32_0 = arith.constant 0 : i32
    %c0_i32_1 = arith.constant 0 : i32
    %c0_i32_2 = arith.constant 0 : i32
    return %c0_i32, %c0_i32_0, %c0_i32_1 : i32, i32, i32
  }
  func.func @transform_3(%arg0: i32) -> (i32, i32, i32) {
    %c0_i32 = arith.constant 0 : i32
    %c0_i32_0 = arith.constant 0 : i32
    %c0_i32_1 = arith.constant 0 : i32
    %c0_i32_2 = arith.constant 0 : i32
    return %c0_i32, %c0_i32_0, %c0_i32_1 : i32, i32, i32
  }
  func.func @transform_4(%arg0: i32) -> (i32, i32, i32) {
    %c0_i32 = arith.constant 0 : i32
    %c0_i32_0 = arith.constant 0 : i32
    %c0_i32_1 = arith.constant 0 : i32
    %c0_i32_2 = arith.constant 0 : i32
    return %c0_i32, %c0_i32_0, %c0_i32_1 : i32, i32, i32
  }
  func.func @transform_5(%arg0: i32) -> (i32, i32, i32) {
    %c0_i32 = arith.constant 0 : i32
    %c0_i32_0 = arith.constant 0 : i32
    %c0_i32_1 = arith.constant 0 : i32
    %c0_i32_2 = arith.constant 0 : i32
    return %c0_i32, %c0_i32_0, %c0_i32_1 : i32, i32, i32
  }
  func.func @transform_6(%arg0: i32) -> (i32, i32) {
    %c0_i32 = arith.constant 0 : i32
    %c0_i32_0 = arith.constant 0 : i32
    %c0_i32_1 = arith.constant 0 : i32
    return %c0_i32, %c0_i32_0 : i32, i32
  }
  func.func @transform_7(%arg0: i32) -> (i32, i32) {
    %c0_i32 = arith.constant 0 : i32
    %c0_i32_0 = arith.constant 0 : i32
    %c0_i32_1 = arith.constant 0 : i32
    return %c0_i32, %c0_i32_0 : i32, i32
  }
  func.func @transform_8(%arg0: i32) -> (i32, i32) {
    %c0_i32 = arith.constant 0 : i32
    %c0_i32_0 = arith.constant 0 : i32
    %c0_i32_1 = arith.constant 0 : i32
    return %c0_i32, %c0_i32_0 : i32, i32
  }
  func.func @transform_9(%arg0: i32) -> (i32, i32) {
    %c0_i32 = arith.constant 0 : i32
    %c0_i32_0 = arith.constant 0 : i32
    %c0_i32_1 = arith.constant 0 : i32
    return %c0_i32, %c0_i32_0 : i32, i32
  }
  func.func @transform_10(%arg0: i32) -> (i32, i32) {
    %c0_i32 = arith.constant 0 : i32
    %c0_i32_0 = arith.constant 0 : i32
    %c0_i32_1 = arith.constant 0 : i32
    return %c0_i32, %c0_i32_0 : i32, i32
  }
  func.func @transform_11(%arg0: i32) -> (i32, i32, i32) {
    %c0_i32 = arith.constant 0 : i32
    %c0_i32_0 = arith.constant 0 : i32
    %c0_i32_1 = arith.constant 0 : i32
    return %arg0, %c0_i32, %c0_i32_0 : i32, i32, i32
  }
}

</mosaic_0001>

<bundles_post_ra>
// kernel: tpu_custom_call.1
= control target key start
LH: loop header
LB: loop body
LE: loop exit
PB: predicated region body
PF: predicated region fallthrough
CT: control target
= control target key end

     0   :  { %s6069_s0 = inlined_call_operand.hbm [shape: f32[2,16,128], index: 0, kind: input, shape index: {}]   ;;  %s6070_s1 = inlined_call_operand.hbm [shape: f32[5,128,128], index: 1, kind: input, shape index: {}]   ;;  %s6071_s2 = inlined_call_operand.hbm [shape: f32[5,128,128], index: 2, kind: input, shape index: {}]   ;;  %s6072_s3 = inlined_call_operand.hbm [shape: f32[5,128,128], index: 3, kind: input, shape index: {}]   ;;  %s6073_s4 = inlined_call_operand.hbm [shape: f32[5,128,128], index: 4, kind: input, shape index: {}]   ;;  %s6074_s5 = inlined_call_operand.hbm [shape: f32[5,128,128], index: 5, kind: input, shape index: {}]   ;;  %s6075_s6 = inlined_call_operand.vmem [shape: f32[1,128], index: 6, kind: input, shape index: {}]   ;;  %s6076_s7 = inlined_call_operand.vmem [shape: f32[1,128], index: 7, kind: input, shape index: {}]   ;;  %s6077_s8 = inlined_call_operand.vmem [shape: f32[1,128], index: 8, kind: input, shape index: {}]   ;;  %s6078_s9 = inlined_call_operand.vmem [shape: f32[1,128], index: 9, kind: input, shape index: {}]   ;;  %s6079_s10 = inlined_call_operand.vmem [shape: f32[1,128], index: 10, kind: input, shape index: {}]   ;;  %s6080_s11 = inlined_call_operand.hbm [shape: f32[2,16,128], index: 11, kind: output, shape index: {}]  }
   0x1   :  { %6086 = sst [smem:[#allocation21_spill]] %s6070_s1 }
   0x2   :  { %6087 = sst [smem:[#allocation22_spill]] %s6078_s9 }
   0x3   :  { %6088 = sst [smem:[#allocation23_spill]] %s6079_s10 }
   0x4   :  { %6089 = sst [smem:[#allocation24_spill]] %s6080_s11 }
   0x5   :  { %16 = vsyncpa [#allocation5], 0 }
   0x6   :  { %18 = vsyncpa [#allocation5 + $0x1], 0 }
   0x7   :  { %19 = vsyncpa [#allocation8], 0 }
   0x8   :  { %20 = vsyncpa [#allocation11], 0 }
   0x9   :  { %21 = vsyncpa [#allocation14], 0 }
   0xa   :  { %22 = vsyncpa [#allocation6], 0 }
   0xb   :  { %24 = vsyncpa [#allocation6 + $0x1], 0  ;;  %s5695_s17 = smov 0   ;;  %s5697_s18 = smov 0  }
   0xc   :  { %s5699_s19 = smov 0   ;;  %s5701_s20 = smov 0  }
   0xd LB: > { %s5623_s21 = smov [#allocation7]   ;;  %s5716_s23 = sadd.s32 4294967295, %s5621_s20   ;;  %s5621_s20 = sphi %s5701_s20, %s6116_s20   ;;  %s5617_s19 = sphi %s5699_s19, %s6115_s19   ;;  %s5613_s18 = sphi %s5697_s18, %s6114_s18   ;;  %s5609_s17 = sphi %s5695_s17, %s6113_s17  }
   0xe   : > { %s309_s22 = sshll.u32 %s5623_s21, 4  ;;  %p3060_p0 = scmp.ge.s32.totalorder %s5621_s20, 1  ;;  %s5721_s22 = int_to_ptr.vmem [resolvable:$true] %s309_s22 }
   0xf   : > { %p6082_p1 = scmp.eq.s32.totalorder %s5716_s23, 0  ;;  %p297_p2 = scmp.lt.s32.totalorder %s5621_s20, 3 }
  0x10   : > { %s5624_s25 = smov [#allocation10]   ;;  %s5625_s28 = smov [#allocation9]  }
  0x11   : > { %p5723_p3 = pnand %p3060_p0, %p297_p2  ;;  %s335_s26 = sshll.u32 %s5624_s25, 4  ;;  %s5736_s26 = int_to_ptr.vmem [resolvable:$true] %s335_s26 }
  0x12   : > { %s322_s29 = sshll.u32 %s5625_s28, 4  ;;  %s6092_s1 = sld [smem:[#allocation21_spill]]  ;;  %s5738_s29 = int_to_ptr.vmem [resolvable:$true] %s322_s29 }
  0x13   : > { %s6090_s24 = scalar_select %p5723_p3, 1, 0 }
  0x14   : > { %p5279_p5 = pneg %p5723_p3 }
  0x16   : > { %p5732_p6 = pnand %p5279_p5, %p6082_p1 }
  0x18   : > { %s5373_s13 = scalar_lea.hbm %s6092_s1, 10240  ;;  %p5748_p8 = pneg %p5732_p6 }
  0x19   : > { %p5374_p7 = scmp.ne.s32.totalorder %s6092_s1, %s5373_s13  ;;  %p5380_p11 = scmp.lt.u32.totalorder %s5373_s13, %s6092_s1 }
  0x1b   : > { %p5376_p9 = pnand %p5748_p8, %p5374_p7 }
  0x1d   : > { %p5377_p10 = pneg %p5376_p9 }
  0x1f   : > { %p5382_p12 = pnand %p5380_p11, %p5377_p10 }
  0x21   : > { %5385 = shalt.err (!%p5382_p12)
}
  0x22   : > { %s5386_s28 = scalar_lea.vmem %s5721_s22, 10240  ;;  %p5394_p5 = scmp.lt.s32.totalorder %s5721_s22, %s5721_s22 }
  0x23   : > { %p5387_p13 = scmp.ne.s32.totalorder %s5721_s22, %s5386_s28  ;;  %p5395_p4 = scmp.lt.s32.totalorder %s5386_s28, %s5386_s28 }
  0x25   : > { %p5389_p0 = pnand %p5387_p13, %p5748_p8  ;;  %p5396_p7 = por %p5395_p4, %p5394_p5 }
  0x27   : > { %p5390_p2 = pneg %p5389_p0 }
  0x29   : > { %p5397_p9 = pnand %p5396_p7, %p5390_p2 }
  0x2b   : > { %5400 = shalt.err (!%p5397_p9)
}
  0x2c   : > { %s6084_s30 = smov 128   ;;  %s5627_s12 = smov 8  }
  0x2d   : > { %5282 = dma.hbm_to_vmem [thread:$0]  (!%p5732_p6), %s6092_s1, 10240, %s5721_s22, [#allocation8], %s6084_s30, %s6084_s30, %s5627_s12  }
  0x2e   : > { %s5401_s25 = scalar_lea.hbm %s6072_s3, 10240 }
  0x2f   : > { %p5402_p4 = scmp.ne.s32.totalorder %s6072_s3, %s5401_s25  ;;  %p5408_p12 = scmp.lt.u32.totalorder %s5401_s25, %s6072_s3 }
  0x31   : > { %p5404_p10 = pnand %p5402_p4, %p5748_p8 }
  0x33   : > { %p5405_p11 = pneg %p5404_p10 }
  0x35   : > { %p5410_p13 = pnand %p5408_p12, %p5405_p11 }
  0x37   : > { %5413 = shalt.err (!%p5410_p13)
}
  0x38   : > { %s5414_s22 = scalar_lea.vmem %s5736_s26, 10240  ;;  %p5422_p7 = scmp.lt.s32.totalorder %s5736_s26, %s5736_s26 }
  0x39   : > { %p5415_p0 = scmp.ne.s32.totalorder %s5736_s26, %s5414_s22  ;;  %p5423_p9 = scmp.lt.s32.totalorder %s5414_s22, %s5414_s22 }
  0x3b   : > { %p5417_p2 = pnand %p5415_p0, %p5748_p8  ;;  %p5424_p4 = por %p5423_p9, %p5422_p7 }
  0x3d   : > { %p5418_p5 = pneg %p5417_p2 }
  0x3f   : > { %p5425_p10 = pnand %p5424_p4, %p5418_p5 }
  0x41   : > { %5428 = shalt.err (!%p5425_p10)
}
  0x42   : > { %5288 = dma.hbm_to_vmem [thread:$0]  (!%p5732_p6), %s6072_s3, 10240, %s5736_s26, [#allocation11], %s6084_s30, %s6084_s30, %s5627_s12  }
  0x43   : > { %s5429_s14 = scalar_lea.hbm %s6071_s2, 10240 }
  0x44   : > { %p5430_p11 = scmp.ne.s32.totalorder %s6071_s2, %s5429_s14  ;;  %p5436_p0 = scmp.lt.u32.totalorder %s5429_s14, %s6071_s2 }
  0x46   : > { %p5432_p12 = pnand %p5430_p11, %p5748_p8 }
  0x48   : > { %p5433_p13 = pneg %p5432_p12 }
  0x4a   : > { %p5438_p2 = pnand %p5436_p0, %p5433_p13 }
  0x4c   : > { %5441 = shalt.err (!%p5438_p2)
}
  0x4d   : > { %s5442_s26 = scalar_lea.vmem %s5738_s29, 10240  ;;  %p5450_p4 = scmp.lt.s32.totalorder %s5738_s29, %s5738_s29 }
  0x4e   : > { %p5443_p5 = scmp.ne.s32.totalorder %s5738_s29, %s5442_s26  ;;  %p5451_p10 = scmp.lt.s32.totalorder %s5442_s26, %s5442_s26 }
  0x50   : > { %p5445_p7 = pnand %p5443_p5, %p5748_p8  ;;  %p5452_p11 = por %p5451_p10, %p5450_p4 }
  0x52   : > { %p5446_p9 = pneg %p5445_p7 }
  0x54   : > { %p5453_p12 = pnand %p5452_p11, %p5446_p9 }
  0x56   : > { %5456 = shalt.err (!%p5453_p12)
}
  0x57   : > { %5285 = dma.hbm_to_vmem [thread:$0]  (!%p5732_p6), %s6071_s2, 10240, %s5738_s29, [#allocation8], %s6084_s30, %s6084_s30, %s5627_s12  }
  0x58   : > { %s5628_s10 = smov [#allocation12]   ;;  %s5629_s13 = smov [#allocation13]  }
  0x59   : > { %s348_s11 = sshll.u32 %s5628_s10, 4  ;;  %s361_s14 = sshll.u32 %s5629_s13, 4  ;;  %s349_s11 = int_to_ptr.vmem [resolvable:$true] %s348_s11  ;;  %s362_s14 = int_to_ptr.vmem [resolvable:$true] %s361_s14 }
  0x5a   : > { %s5457_s25 = scalar_lea.hbm %s6073_s4, 10240 }
  0x5b   : > { %p5458_p13 = scmp.ne.s32.totalorder %s6073_s4, %s5457_s25  ;;  %p5464_p5 = scmp.lt.u32.totalorder %s5457_s25, %s6073_s4 }
  0x5d   : > { %p5460_p0 = pnand %p5458_p13, %p5748_p8 }
  0x5f   : > { %p5461_p2 = pneg %p5460_p0 }
  0x61   : > { %p5466_p7 = pnand %p5464_p5, %p5461_p2 }
  0x63   : > { %5469 = shalt.err (!%p5466_p7)
}
  0x64   : > { %s5470_s29 = scalar_lea.vmem %s349_s11, 10240  ;;  %p5478_p11 = scmp.lt.s32.totalorder %s349_s11, %s349_s11 }
  0x65   : > { %p5471_p9 = scmp.ne.s32.totalorder %s349_s11, %s5470_s29  ;;  %p5479_p12 = scmp.lt.s32.totalorder %s5470_s29, %s5470_s29 }
  0x67   : > { %p5473_p4 = pnand %p5471_p9, %p5748_p8  ;;  %p5480_p1 = por %p5479_p12, %p5478_p11 }
  0x69   : > { %p5474_p10 = pneg %p5473_p4 }
  0x6b   : > { %p5481_p3 = pnand %p5480_p1, %p5474_p10 }
  0x6d   : > { %5484 = shalt.err (!%p5481_p3)
}
  0x6e   : > { %5291 = dma.hbm_to_vmem [thread:$0]  (!%p5732_p6), %s6073_s4, 10240, %s349_s11, [#allocation11], %s6084_s30, %s6084_s30, %s5627_s12  }
  0x6f   : > { %s5485_s15 = scalar_lea.hbm %s6074_s5, 10240 }
  0x70   : > { %p5486_p1 = scmp.ne.s32.totalorder %s6074_s5, %s5485_s15  ;;  %p5492_p0 = scmp.lt.u32.totalorder %s5485_s15, %s6074_s5 }
  0x72   : > { %p5488_p3 = pnand %p5486_p1, %p5748_p8 }
  0x74   : > { %p5489_p13 = pneg %p5488_p3 }
  0x76   : > { %p5494_p2 = pnand %p5492_p0, %p5489_p13 }
  0x78   : > { %5497 = shalt.err (!%p5494_p2)
}
  0x79   : > { %s5498_s22 = scalar_lea.vmem %s362_s14, 10240  ;;  %p5506_p4 = scmp.lt.s32.totalorder %s362_s14, %s362_s14 }
  0x7a   : > { %p5499_p5 = scmp.ne.s32.totalorder %s362_s14, %s5498_s22  ;;  %p5507_p10 = scmp.lt.s32.totalorder %s5498_s22, %s5498_s22 }
  0x7c   : > { %p5501_p7 = pnand %p5499_p5, %p5748_p8  ;;  %p5508_p11 = por %p5507_p10, %p5506_p4 }
  0x7e   : > { %p5502_p9 = pneg %p5501_p7 }
  0x80   : > { %p5509_p12 = pnand %p5508_p11, %p5502_p9 }
  0x82   : > { %5512 = shalt.err (!%p5509_p12)
}
  0x83   : > { %5294 = dma.hbm_to_vmem [thread:$0]  (!%p5732_p6), %s6074_s5, 10240, %s362_s14, [#allocation14], %s6084_s30, %s6084_s30, %s5627_s12  }
  0x84   : > { %s3059_s27 = sadd.s32 4294967294, %s5621_s20   ;;  %s5868_s16 = sadd.s32 1, %s5621_s20  }
  0x85   : > { %s37_s1 = sadd.s32 1, %s5617_s19  ;;  %s34_s9 = ssub.s32 %s5621_s20, %s5868_s16 }
  0x86   : > { %p44_p8 = scmp.ne.s32.totalorder %s5617_s19, %s5613_s18  ;;  %p35_p1 = scmp.eq.s32.totalorder %s34_s9, 0 }
  0x87   : > { %p45_p3 = scmp.eq.s32.totalorder %s5621_s20, 0  ;;  %p50_p13 = scmp.ne.s32.totalorder %s5613_s18, %s5609_s17 }
  0x88   : > { %p284_p0 = scmp.eq.s32.totalorder %s5716_s23, 1  ;;  %p6094_p5 = scmp.eq.s32.totalorder %s5716_s23, 0 }
  0x89   : > { %s5880_s10 = scalar_select %p35_p1, %s5617_s19, %s37_s1  }
  0x8a   : > { %p46_p2 = por %p45_p3, %p44_p8  ;;  %p5884_p7 = por %p6094_p5, %p50_p13 }
  0x8b   : > { %p5888_p6 = por %p284_p0, %p44_p8  ;;  %p290_p9 = scmp.eq.s32.totalorder %s3059_s27, 1 }
  0x8c   : > { %p5308_p4 = scmp.lt.s32.totalorder %s5621_s20, 2  ;;  %s390_s15 = sand.u32 1, %s5617_s19  }
  0x8d   : > { %s6096_s14 = scalar_select %p5888_p6, 1, 0 }
  0x8e   : > { %p5894_p10 = por %p290_p9, %p50_p13  ;;  %s3067_s25 = sshll.u32 %s390_s15, 4 }
  0x8f   : > { %s3088_s28 = sshll.u32 %s5621_s20, 8  ;;  %s394_s29 = scalar_lea.vmem [#allocation4], %s3067_s25 }
  0x90   : > { %s6097_s21 = scalar_select %p5894_p10, 1, 0 }
  0x91   : > { %s5902_s11 = scalar_lea.hbm %s6069_s0, %s3088_s28  ;;  %s401_s1 = sshll.u32 %s394_s29, 4  ;;  %s5908_s1 = int_to_ptr.vmem [resolvable:$true] %s401_s1 }
  0x92   : > { %p5904_p11 = pnand %p5308_p4, %p46_p2  ;;  %s5910_s9 = scalar_lea.sflag [#allocation5], %s390_s15 }
  0x93   : > { %s5513_s30 = scalar_lea.hbm %s5902_s11, 256  ;;  %s5518_s26 = scalar_lea.hbm %s6069_s0, 512 }
  0x94   : > { %p5514_p12 = scmp.ne.s32.totalorder %s5902_s11, %s5513_s30  ;;  %p5515_p8 = pneg %p5904_p11 }
  0x95   : > { %p5519_p13 = scmp.lt.u32.totalorder %s5902_s11, %s6069_s0  ;;  %p5520_p0 = scmp.lt.u32.totalorder %s5518_s26, %s5513_s30 }
  0x96   : > { %p5516_p1 = pnand %p5515_p8, %p5514_p12  ;;  %p5522_p5 = scmp.lt.u32.totalorder %s5513_s30, %s5902_s11 }
  0x97   : > { %p5521_p2 = por %p5520_p0, %p5519_p13 }
  0x98   : > { %p5517_p3 = pneg %p5516_p1 }
  0x99   : > { %p5523_p9 = por %p5522_p5, %p5521_p2 }
  0x9b   : > { %p5524_p4 = pnand %p5523_p9, %p5517_p3 }
  0x9d   : > { %5527 = shalt.err (!%p5524_p4)
}
  0x9e   : > { %s5528_s15 = scalar_lea.vmem %s5908_s1, 256  ;;  %s5630_s25 = smov [#allocation4]  }
  0x9f   : > { %p5529_p12 = scmp.ne.s32.totalorder %s5908_s1, %s5528_s15  ;;  %s5533_s28 = sshll.u32 %s5630_s25, 4  ;;  %s5534_s28 = int_to_ptr.vmem [resolvable:$false] %s5533_s28 }
  0xa0   : > { %s5535_s22 = scalar_lea.vmem %s5534_s28, 512  ;;  %p5536_p6 = scmp.lt.s32.totalorder %s5908_s1, %s5534_s28 }
  0xa1   : > { %p5531_p1 = pnand %p5529_p12, %p5515_p8  ;;  %p5537_p13 = scmp.lt.s32.totalorder %s5535_s22, %s5528_s15 }
  0xa3   : > { %p5532_p10 = pneg %p5531_p1  ;;  %p5538_p0 = por %p5537_p13, %p5536_p6 }
  0xa5   : > { %p5539_p2 = pnand %p5538_p0, %p5532_p10 }
  0xa7   : > { %5542 = shalt.err (!%p5539_p2)
}
  0xa8   : > { %s6099_s30 = smov 128   ;;  %p6100_p8 = scmp.ne.s32.totalorder %s6090_s24, 0 }
  0xa9   : > { %5298 = dma.hbm_to_vmem [thread:$0]  (!%p5904_p11), %s5902_s11, 256, %s5908_s1, %s5910_s9, %s6099_s30, %s6099_s30, %s5627_s12  }
  0xaa   : > { %413 = sbr.rel (%p6100_p8) target bundleno = 1972 (0x7b4), region = 64  ;;  %s5944_s26 = sand.u32 (!%p6100_p8), 1, %s5613_s18  }
  0xab   : > { %s3071_s29 = sshll.u32 (!%p6100_p8), %s5944_s26, 4  ;;  %s416_s15 = scalar_lea.sflag (!%p6100_p8), [#allocation5], %s5944_s26 }
  0xac   : > { %s5950_s27 = scalar_lea.vmem (!%p6100_p8), [#allocation4], %s3071_s29 }
  0xb1   : > { %5588 = dma.done.wait (%p5884_p7), %s416_s15, 256  }
  0xb2   : > { %5590 = vsyncadd (%p5884_p7), %s416_s15, 4294967040  ;;  %p6101_p6 = scmp.eq.s32.totalorder %s5716_s23, 0 }
  0xb4   : > { %5592 = dma.done.wait (%p6101_p6), [#allocation8], 20480   ;;  %p6102_p10 = pmov %p6101_p6 }
  0xb5   : > { %p6103_p11 = pmov %p6101_p6 }
  0xb6   : > { %5594 = vsyncadd (%p6102_p10), [#allocation8], 4294946816 }
  0xb7   : > { %5596 = dma.done.wait (%p6103_p11), [#allocation11], 20480   ;;  %p6104_p3 = pmov %p6101_p6 }
  0xb9   : > { %5598 = vsyncadd (%p6104_p3), [#allocation11], 4294946816  ;;  %p6105_p5 = pmov %p6104_p3 }
  0xba   : > { %p6106_p9 = pmov %p6104_p3 }
  0xbb   : > { %5600 = dma.done.wait (%p6105_p5), [#allocation14], 10240  }
  0xbc   : > { %5602 = vsyncadd (%p6106_p9), [#allocation14], 4294957056  ;;  %v5631_v0 = vmov 0.0   ;;  %v507_v1 = vld [vmem:[#allocation7 + $0x80] sm:$0xff]  ;;  %v508_v2 = vld [vmem:[#allocation7 + $0x88] sm:$0xff]  ;;  %s6107_s22 = sld [smem:[#allocation22_spill]] }
  0xbd   : > { %478 = vst [vmem:[#allocation2 + $0x6] sm:$0x3] %v5631_v0  ;;  %479 = vst [vmem:[#allocation2 + $0x18] sm:$0x3] %v5631_v0  ;;  %v676_v3 = vld [vmem:[#allocation7 + $0x100] sm:$0xff]  ;;  %v4415_v4 = vpack.c.bf16 %v508_v2, %v507_v1  ;;  %v677_v5 = vld [vmem:[#allocation7 + $0x108] sm:$0xff] }
  0xbe   : > { %480 = vst [vmem:[#allocation3 + $0x6] sm:$0x3] %v5631_v0  ;;  %481 = vst [vmem:[#allocation3 + $0x18] sm:$0x3] %v5631_v0  ;;  %v509_v6 = vld [vmem:[#allocation7 + $0x90] sm:$0xff]  ;;  %v510_v7 = vld [vmem:[#allocation7 + $0x98] sm:$0xff]  ;;  %v4479_v8 = vpack.c.bf16 %v677_v5, %v676_v3 }
  0xbf   : > { %v4419_v9 = vpack.c.bf16 %v510_v7, %v509_v6  ;;  %v678_v10 = vld [vmem:[#allocation7 + $0x110] sm:$0xff]  ;;  %v679_v11 = vld [vmem:[#allocation7 + $0x118] sm:$0xff]  ;;  %v511_v12 = vld [vmem:[#allocation7 + $0xa0] sm:$0xff]  ;;  %4416 = vmatprep.subr.bf16.mxu1 %v4415_v4  ;;  %s477_s30 = scalar_lea.vmem [#allocation15], %s3071_s29  ;;  %s6108_s12 = sld [smem:[#allocation23_spill]] }
  0xc0   : > { %v4483_v13 = vpack.c.bf16 %v679_v11, %v678_v10  ;;  %v512_v14 = vld [vmem:[#allocation7 + $0xa8] sm:$0xff]  ;;  %v680_v15 = vld [vmem:[#allocation7 + $0x120] sm:$0xff]  ;;  %4480 = vmatprep.subr.bf16.mxu0 %v4479_v8  ;;  %4418 = vmatpush3.bf16.msra.mxu1 %v4415_v4  ;;  %v513_v19 = vld [vmem:[#allocation7 + $0xb0] sm:$0xff]  ;;  %s2938_s15 = sshll.u32 %s477_s30, 4  ;;  %s3089_s13 = sshll.u32 %s5716_s23, 8  ;;  %s6020_s15 = int_to_ptr.vmem [resolvable:$true] %s2938_s15 }
  0xc1   : > { %v681_v16 = vld [vmem:[#allocation7 + $0x128] sm:$0xff]  ;;  %4482 = vmatpush3.bf16.msra.mxu0 %v4479_v8  ;;  %4420 = vmatprep.subr.bf16.mxu1 %v4419_v9  ;;  %v4423_v17 = vpack.c.bf16 %v512_v14, %v511_v12  ;;  %v514_v20 = vld [vmem:[#allocation7 + $0xb8] sm:$0xff]  ;;  %v682_v21 = vld [vmem:[#allocation7 + $0x130] sm:$0xff]  ;;  %s6109_s9 = sld [smem:[#allocation24_spill]]  ;;  %s2925_s29 = scalar_lea.sflag [#allocation6], %s5944_s26 }
  0xc2   : > { %4484 = vmatprep.subr.bf16.mxu0 %v4483_v13  ;;  %v4487_v18 = vpack.c.bf16 %v681_v16, %v680_v15  ;;  %v683_v22 = vld [vmem:[#allocation7 + $0x138] sm:$0xff]  ;;  %v4427_v23 = vpack.c.bf16 %v514_v20, %v513_v19  ;;  %v515_v25 = vld [vmem:[#allocation7 + $0xc0] sm:$0xff]  ;;  %v516_v26 = vld [vmem:[#allocation7 + $0xc8] sm:$0xff]  ;;  %s5543_s28 = scalar_lea.vmem %s6020_s15, 256  ;;  %p6110_p4 = scmp.ne.s32.totalorder %s6096_s14, 0 }
  0xc3   : > { %v4491_v24 = vpack.c.bf16 %v683_v22, %v682_v21  ;;  %v482_v27 = vld [vmem:[%s5950_s27] sm:$0xff]  ;;  %v685_v29 = vld [vmem:[#allocation7 + $0x148] sm:$0xff]  ;;  %v4431_v31 = vpack.c.bf16 %v516_v26, %v515_v25  ;;  %v518_v34 = vld [vmem:[#allocation7 + $0xd8] sm:$0xff]  ;;  %p5544_p7 = scmp.ne.s32.totalorder %s6020_s15, %s5543_s28  ;;  %s5632_s23 = smov [#allocation15]  }
  0xc4   : > { %4422 = vmatpush3.bf16.msra.mxu1 %v4419_v9  ;;  %v684_v28 = vld [vmem:[#allocation7 + $0x140] sm:$0xff]  ;;  %484 = vst [vmem:[#allocation2 + $0x8] sm:$0xff] %v482_v27  ;;  %3642 = vmatprep.mubr.f32.mxu0 %v482_v27  ;;  %v5970_v30 = vld [vmem:[%s5950_s27 + $0x8] sm:$0xff]  ;;  %v517_v33 = vld [vmem:[#allocation7 + $0xd0] sm:$0xff] }
  0xc5   : > { %4486 = vmatpush3.bf16.msra.mxu0 %v4483_v13  ;;  %4424 = vmatprep.subr.bf16.mxu1 %v4423_v17  ;;  %485 = vst [vmem:[#allocation2 + $0x10] sm:$0xff] %v5970_v30  ;;  %v4495_v32 = vpack.c.bf16 %v685_v29, %v684_v28  ;;  %v686_v35 = vld [vmem:[#allocation7 + $0x150] sm:$0xff]  ;;  %v687_v36 = vld [vmem:[#allocation7 + $0x158] sm:$0xff]  ;;  %v4435_v37 = vpack.c.bf16 %v518_v34, %v517_v33  ;;  %v519_v39 = vld [vmem:[#allocation7 + $0xe0] sm:$0xff]  ;;  %p5545_p12 = pnand %p5544_p7, %p6110_p4 }
  0xc6   : > { %4488 = vmatprep.subr.bf16.mxu0 %v4487_v18  ;;  %v4499_v38 = vpack.c.bf16 %v687_v36, %v686_v35  ;;  %v520_v40 = vld [vmem:[#allocation7 + $0xe8] sm:$0xff]  ;;  %v688_v42 = vld [vmem:[#allocation7 + $0x160] sm:$0xff]  ;;  %v521_v46 = vld [vmem:[#allocation7 + $0xf0] sm:$0xff] }
  0xc7   : > { %v689_v43 = vld [vmem:[#allocation7 + $0x168] sm:$0xff]  ;;  %v4439_v44 = vpack.c.bf16 %v520_v40, %v519_v39  ;;  %v522_v47 = vld [vmem:[#allocation7 + $0xf8] sm:$0xff]  ;;  %v690_v48 = vld [vmem:[#allocation7 + $0x170] sm:$0xff]  ;;  %s6025_s25 = scalar_lea.hbm %s6109_s9, %s3089_s13  ;;  %p5546_p1 = pneg %p5545_p12 }
  0xc8   : > { %4426 = vmatpush3.bf16.msra.mxu1 %v4423_v17  ;;  %v4503_v45 = vpack.c.bf16 %v689_v43, %v688_v42  ;;  %v691_v49 = vld [vmem:[#allocation7 + $0x178] sm:$0xff]  ;;  %v4443_v50 = vpack.c.bf16 %v522_v47, %v521_v46  ;;  %v488_v52 = vld [vmem:[#allocation7] sm:$0xff]  ;;  %v489_v53 = vld [vmem:[#allocation7 + $0x8] sm:$0xff] }
  0xc9   : > { %4490 = vmatpush3.bf16.msra.mxu0 %v4487_v18  ;;  %4428 = vmatprep.subr.bf16.mxu1 %v4427_v23  ;;  %v4507_v51 = vpack.c.bf16 %v691_v49, %v690_v48  ;;  %v772_v54 = vld [vmem:[#allocation7 + $0x180] sm:$0xff]  ;;  %v773_v55 = vld [vmem:[#allocation7 + $0x188] sm:$0xff]  ;;  %v4447_v56 = vpack.c.bf16 %v489_v53, %v488_v52  ;;  %v490_v58 = vld [vmem:[#allocation7 + $0x10] sm:$0xff] }
  0xca   : > { %4492 = vmatprep.subr.bf16.mxu0 %v4491_v24  ;;  %v4511_v57 = vpack.c.bf16 %v773_v55, %v772_v54  ;;  %v491_v59 = vld [vmem:[#allocation7 + $0x18] sm:$0xff]  ;;  %v774_v60 = vld [vmem:[#allocation7 + $0x190] sm:$0xff]  ;;  %v492_v1 = vld [vmem:[#allocation7 + $0x20] sm:$0xff] }
  0xcb   : > { %v504_v41 = vld [vmem:[#allocation2 + $0x7] sm:$0xff]  ;;  %v775_v61 = vld [vmem:[#allocation7 + $0x198] sm:$0xff]  ;;  %v4451_v63 = vpack.c.bf16 %v491_v59, %v490_v58  ;;  %v494_v9 = vld [vmem:[#allocation7 + $0x30] sm:$0xff] }
  0xcc   : > { %4430 = vmatpush3.bf16.msra.mxu1 %v4427_v23  ;;  %3572 = vmatprep.mubr.f32.mxu1 %v504_v41  ;;  %v505_v62 = vld [vmem:[#allocation2 + $0xf] sm:$0xff]  ;;  %v4515_v0 = vpack.c.bf16 %v775_v61, %v774_v60  ;;  %v776_v3 = vld [vmem:[#allocation7 + $0x1a0] sm:$0xff]  ;;  %v495_v10 = vld [vmem:[#allocation7 + $0x38] sm:$0xff] }
  0xcd   : > { %4494 = vmatpush3.bf16.msra.mxu0 %v4491_v24  ;;  %4432 = vmatprep.subr.bf16.mxu1 %v4431_v31  ;;  %v493_v2 = vld [vmem:[#allocation7 + $0x28] sm:$0xff]  ;;  %v778_v11 = vld [vmem:[#allocation7 + $0x1b0] sm:$0xff]  ;;  %v779_v12 = vld [vmem:[#allocation7 + $0x1b8] sm:$0xff]  ;;  %v4459_v13 = vpack.c.bf16 %v495_v10, %v494_v9 }
  0xce   : > { %4496 = vmatprep.subr.bf16.mxu0 %v4495_v32  ;;  %v777_v4 = vld [vmem:[#allocation7 + $0x1a8] sm:$0xff]  ;;  %v4455_v7 = vpack.c.bf16 %v493_v2, %v492_v1  ;;  %v4523_v14 = vpack.c.bf16 %v779_v12, %v778_v11  ;;  %v496_v15 = vld [vmem:[#allocation7 + $0x40] sm:$0xff]  ;;  %v498_v21 = vld [vmem:[#allocation7 + $0x50] sm:$0xff] }
  0xcf   : > { %v486_v5 = vld [vmem:[#allocation2 + $0x6] sm:$0xff]  ;;  %v4519_v8 = vpack.c.bf16 %v777_v4, %v776_v3  ;;  %v499_v22 = vld [vmem:[#allocation7 + $0x58] sm:$0xff]  ;;  %v782_v23 = vld [vmem:[#allocation7 + $0x1d0] sm:$0xff] }
  0xd0   : > { %4434 = vmatpush3.bf16.msra.mxu1 %v4431_v31  ;;  %v769_v6 = vld [vmem:[#allocation2 + $0x9] sm:$0xff]  ;;  %v780_v17 = vld [vmem:[#allocation7 + $0x1c0] sm:$0xff]  ;;  %v783_v24 = vld [vmem:[#allocation7 + $0x1d8] sm:$0xff]  ;;  %v4467_v25 = vpack.c.bf16 %v499_v22, %v498_v21 }
  0xd1   : > { %4498 = vmatpush3.bf16.msra.mxu0 %v4495_v32  ;;  %4436 = vmatprep.subr.bf16.mxu1 %v4435_v37  ;;  %v497_v16 = vld [vmem:[#allocation7 + $0x48] sm:$0xff]  ;;  %v4531_v26 = vpack.c.bf16 %v783_v24, %v782_v23  ;;  %v500_v27 = vld [vmem:[#allocation7 + $0x60] sm:$0xff]  ;;  %v502_v33 = vld [vmem:[#allocation7 + $0x70] sm:$0xff] }
  0xd2   : > { %4500 = vmatprep.subr.bf16.mxu0 %v4499_v38  ;;  %v781_v18 = vld [vmem:[#allocation7 + $0x1c8] sm:$0xff]  ;;  %v4463_v19 = vpack.c.bf16 %v497_v16, %v496_v15  ;;  %v784_v29 = vld [vmem:[#allocation7 + $0x1e0] sm:$0xff]  ;;  %v503_v34 = vld [vmem:[#allocation7 + $0x78] sm:$0xff] }
  0xd3   : > { %v4527_v20 = vpack.c.bf16 %v781_v18, %v780_v17  ;;  %v501_v28 = vld [vmem:[#allocation7 + $0x68] sm:$0xff]  ;;  %v786_v35 = vld [vmem:[#allocation7 + $0x1f0] sm:$0xff]  ;;  %v787_v36 = vld [vmem:[#allocation7 + $0x1f8] sm:$0xff] }
  0xd4   : > { %4438 = vmatpush3.bf16.msra.mxu1 %v4435_v37  ;;  %v4471_v31 = vpack.c.bf16 %v501_v28, %v500_v27  ;;  %v4475_v37 = vpack.c.bf16 %v503_v34, %v502_v33  ;;  %v868_v39 = vld [vmem:[#allocation7 + $0x200] sm:$0xff]  ;;  %v869_v40 = vld [vmem:[#allocation7 + $0x208] sm:$0xff]  ;;  %v870_v42 = vld [vmem:[#allocation7 + $0x210] sm:$0xff] }
  0xd5   : > { %4502 = vmatpush3.bf16.msra.mxu0 %v4499_v38  ;;  %4440 = vmatprep.subr.bf16.mxu1 %v4439_v44  ;;  %v4539_v38 = vpack.c.bf16 %v787_v36, %v786_v35  ;;  %v4543_v41 = vpack.c.bf16 %v869_v40, %v868_v39  ;;  %v871_v43 = vld [vmem:[#allocation7 + $0x218] sm:$0xff]  ;;  %v865_v47 = vld [vmem:[#allocation2 + $0xa] sm:$0xff]  ;;  %v872_v48 = vld [vmem:[#allocation7 + $0x220] sm:$0xff] }
  0xd6   : > { %4504 = vmatprep.subr.bf16.mxu0 %v4503_v45  ;;  %v4547_v46 = vpack.c.bf16 %v871_v43, %v870_v42  ;;  %v873_v49 = vld [vmem:[#allocation7 + $0x228] sm:$0xff]  ;;  %v875_v52 = vld [vmem:[#allocation7 + $0x238] sm:$0xff]  ;;  %v876_v54 = vld [vmem:[#allocation7 + $0x240] sm:$0xff] }
  0xd7   : > { %v877_v55 = vld [vmem:[#allocation7 + $0x248] sm:$0xff]  ;;  %v879_v58 = vld [vmem:[#allocation7 + $0x258] sm:$0xff]  ;;  %v880_v60 = vld [vmem:[#allocation7 + $0x260] sm:$0xff] }
  0xd8   : > { %4442 = vmatpush3.bf16.msra.mxu1 %v4439_v44  ;;  %v487_v44 = vld [vmem:[#allocation2 + $0xe] sm:$0xff]  ;;  %v995_v3 = vld [vmem:[#allocation9 + $0x80] sm:$0xff]  ;;  %v979_v42 = vld [vmem:[#allocation9 + $0x18] sm:$0xff] }
  0xd9   : > { %4506 = vmatpush3.bf16.msra.mxu0 %v4503_v45  ;;  %4444 = vmatprep.subr.bf16.mxu1 %v4443_v50  ;;  %v770_v45 = vld [vmem:[#allocation2 + $0x11] sm:$0xff]  ;;  %v881_v61 = vld [vmem:[#allocation7 + $0x268] sm:$0xff]  ;;  %v999_v9 = vld [vmem:[#allocation9 + $0xa0] sm:$0xff] }
  0xda   : > { %4508 = vmatprep.subr.bf16.mxu0 %v4507_v51  ;;  %v866_v2 = vld [vmem:[#allocation2 + $0x12] sm:$0xff]  ;;  %v996_v4 = vld [vmem:[#allocation9 + $0x88] sm:$0xff]  ;;  %v1003_v15 = vld [vmem:[#allocation9 + $0xc0] sm:$0xff] }
  0xdb   : > { %v1000_v10 = vld [vmem:[#allocation9 + $0xa8] sm:$0xff]  ;;  %v1001_v12 = vld [vmem:[#allocation9 + $0xb0] sm:$0xff]  ;;  %v1007_v21 = vld [vmem:[#allocation9 + $0xe0] sm:$0xff] }
  0xdc   : > { %4446 = vmatpush3.bf16.msra.mxu1 %v4443_v50  ;;  %v4551_v50 = vpack.c.bf16 %v873_v49, %v872_v48  ;;  %v4583_v11 = vpack.c.bf16 %v1000_v10, %v999_v9  ;;  %v1004_v16 = vld [vmem:[#allocation9 + $0xc8] sm:$0xff]  ;;  %v1005_v18 = vld [vmem:[#allocation9 + $0xd0] sm:$0xff]  ;;  %v976_v27 = vld [vmem:[#allocation9] sm:$0xff] }
  0xdd   : > { %4510 = vmatpush3.bf16.msra.mxu0 %v4507_v51  ;;  %4448 = vmatprep.subr.bf16.mxu1 %v4447_v56  ;;  %v874_v51 = vld [vmem:[#allocation7 + $0x230] sm:$0xff]  ;;  %v4591_v17 = vpack.c.bf16 %v1004_v16, %v1003_v15  ;;  %v1008_v22 = vld [vmem:[#allocation9 + $0xe8] sm:$0xff]  ;;  %v3078_v33 = vld [vmem:[%s6075_s6] ss:$0 sm:$0xff] }
  0xde   : > { %4512 = vmatprep.subr.bf16.mxu0 %v4511_v57  ;;  %v4555_v53 = vpack.c.bf16 %v875_v52, %v874_v51  ;;  %v4599_v23 = vpack.c.bf16 %v1008_v22, %v1007_v21  ;;  %v1009_v24 = vld [vmem:[#allocation9 + $0xf0] sm:$0xff]  ;;  %v977_v28 = vld [vmem:[#allocation9 + $0x8] sm:$0xff]  ;;  %v1483_v49 = vld [vmem:[#allocation10 + $0x80] sm:$0xff] }
  0xdf   : > { %3573 = vmatmul.mubr.f32.vlgmr.msra.gmra.mrb[0].mxu1 %v505_v62  ;;  %v4567_v62 = vpack.c.bf16 %v881_v61, %v880_v60  ;;  %v981_v48 = vld [vmem:[#allocation9 + $0x28] sm:$0xff]  ;;  %v1485_v51 = vld [vmem:[#allocation10 + $0x90] sm:$0xff]  ;;  %v1164_v10 = vld [vmem:[#allocation9 + $0x100] sm:$0xff] }
  0xe0   : > { %4450 = vmatpush3.bf16.msra.mxu1 %v4447_v56  ;;  %3643 = vmatmul.mubr.f32.vlgmr.msra.gmra.mrb[0].mxu0 %v5970_v30  ;;  %v785_v30 = vld [vmem:[#allocation7 + $0x1e8] sm:$0xff]  ;;  %v4559_v56 = vpack.c.bf16 %v877_v55, %v876_v54  ;;  %v1171_v21 = vld [vmem:[#allocation9 + $0x138] sm:$0xff] }
  0xe1   : > { %4514 = vmatpush3.bf16.msra.mxu0 %v4511_v57  ;;  %4452 = vmatprep.subr.bf16.mxu1 %v4451_v63  ;;  %v4535_v32 = vpack.c.bf16 %v785_v30, %v784_v29  ;;  %v878_v57 = vld [vmem:[#allocation7 + $0x250] sm:$0xff]  ;;  %v4607_v29 = vpack.c.bf16 %v977_v28, %v976_v27  ;;  %v1175_v27 = vld [vmem:[#allocation9 + $0x158] sm:$0xff] }
  0xe2   : > { %4516 = vmatprep.subr.bf16.mxu0 %v4515_v0  ;;  %3607 = vmatprep.mubr.f32.mxu1 %v486_v5  ;;  %v4563_v59 = vpack.c.bf16 %v879_v58, %v878_v57  ;;  %v997_v5 = vld [vmem:[#allocation9 + $0x90] sm:$0xff]  ;;  %v1488_v57 = vld [vmem:[#allocation10 + $0xa8] sm:$0xff] }
  0xe3   : > { %3677 = vmatprep.mubr.f32.mxu0 %v769_v6  ;;  %v4575_v6 = vpack.c.bf16 %v996_v4, %v995_v3  ;;  %v982_v58 = vld [vmem:[#allocation9 + $0x30] sm:$0xff]  ;;  %v988_v4 = vld [vmem:[#allocation9 + $0x60] sm:$0xff] }
  0xe4   : > { %4454 = vmatpush3.bf16.msra.mxu1 %v4451_v63  ;;  %v882_v63 = vld [vmem:[#allocation7 + $0x270] sm:$0xff] }
  0xe5   : > { %4518 = vmatpush3.bf16.msra.mxu0 %v4515_v0  ;;  %4456 = vmatprep.subr.bf16.mxu1 %v4455_v7  ;;  %v883_v0 = vld [vmem:[#allocation7 + $0x278] sm:$0xff] }
  0xe6   : > { %4520 = vmatprep.subr.bf16.mxu0 %v4519_v8  ;;  %v4571_v1 = vpack.c.bf16 %v883_v0, %v882_v63  ;;  %v985_v63 = vld [vmem:[#allocation9 + $0x48] sm:$0xff] }
  0xe8   : > { %4458 = vmatpush3.bf16.msra.mxu1 %v4455_v7  ;;  %v998_v7 = vld [vmem:[#allocation9 + $0x98] sm:$0xff] }
  0xe9   : > { %4522 = vmatpush3.bf16.msra.mxu0 %v4519_v8  ;;  %4460 = vmatprep.subr.bf16.mxu1 %v4459_v13  ;;  %v4579_v8 = vpack.c.bf16 %v998_v7, %v997_v5  ;;  %v989_v5 = vld [vmem:[#allocation9 + $0x68] sm:$0xff]  ;;  %v990_v7 = vld [vmem:[#allocation9 + $0x70] sm:$0xff] }
  0xea   : > { %4524 = vmatprep.subr.bf16.mxu0 %v4523_v14 }
  0xec   : > { %4462 = vmatpush3.bf16.msra.mxu1 %v4459_v13  ;;  %v1002_v13 = vld [vmem:[#allocation9 + $0xb8] sm:$0xff] }
  0xed   : > { %4526 = vmatpush3.bf16.msra.mxu0 %v4523_v14  ;;  %4464 = vmatprep.subr.bf16.mxu1 %v4463_v19  ;;  %v4587_v14 = vpack.c.bf16 %v1002_v13, %v1001_v12  ;;  %v1166_v13 = vld [vmem:[#allocation9 + $0x110] sm:$0xff] }
  0xee   : > { %4528 = vmatprep.subr.bf16.mxu0 %v4527_v20 }
  0xf0   : > { %4466 = vmatpush3.bf16.msra.mxu1 %v4463_v19  ;;  %v1006_v19 = vld [vmem:[#allocation9 + $0xd8] sm:$0xff] }
  0xf1   : > { %4530 = vmatpush3.bf16.msra.mxu0 %v4527_v20  ;;  %4468 = vmatprep.subr.bf16.mxu1 %v4467_v25  ;;  %v4595_v20 = vpack.c.bf16 %v1006_v19, %v1005_v18  ;;  %v1169_v18 = vld [vmem:[#allocation9 + $0x128] sm:$0xff] }
  0xf2   : > { %4532 = vmatprep.subr.bf16.mxu0 %v4531_v26 }
  0xf4   : > { %4470 = vmatpush3.bf16.msra.mxu1 %v4467_v25  ;;  %v1010_v25 = vld [vmem:[#allocation9 + $0xf8] sm:$0xff] }
  0xf5   : > { %4534 = vmatpush3.bf16.msra.mxu0 %v4531_v26  ;;  %4472 = vmatprep.subr.bf16.mxu1 %v4471_v31  ;;  %v4603_v26 = vpack.c.bf16 %v1010_v25, %v1009_v24  ;;  %v1173_v24 = vld [vmem:[#allocation9 + $0x148] sm:$0xff] }
  0xf6   : > { %4536 = vmatprep.subr.bf16.mxu0 %v4535_v32 }
  0xf8   : > { %4474 = vmatpush3.bf16.msra.mxu1 %v4471_v31 }
  0xf9   : > { %4538 = vmatpush3.bf16.msra.mxu0 %v4535_v32  ;;  %4476 = vmatprep.subr.bf16.mxu1 %v4475_v37 }
  0xfa   : > { %4540 = vmatprep.subr.bf16.mxu0 %v4539_v38 }
  0xfc   : > { %4478 = vmatpush3.bf16.msra.mxu1 %v4475_v37 }
  0xfd   : > { %4542 = vmatpush3.bf16.msra.mxu0 %v4539_v38  ;;  %4576 = vmatprep.subr.bf16.mxu1 %v4575_v6 }
  0xfe   : > { %4544 = vmatprep.subr.bf16.mxu0 %v4543_v41 }
  0xff   : > { %3608 = vmatmul.mubr.f32.vlgmr.msra.gmra.mrb[0].mxu1 %v487_v44 }
 0x100   : > { %3678 = vmatmul.mubr.f32.vlgmr.msra.gmra.mrb[0].mxu0 %v770_v45  ;;  %4578 = vmatpush3.bf16.msra.mxu1 %v4575_v6  ;;  %v4631_v6 = vpack.c.bf16 %v989_v5, %v988_v4  ;;  %v1361_v4 = vld [vmem:[#allocation9 + $0x228] sm:$0xff] }
 0x101   : > { %4546 = vmatpush3.bf16.msra.mxu0 %v4543_v41  ;;  %3712 = vmatprep.mubr.f32.mxu0 %v865_v47  ;;  %v978_v41 = vld [vmem:[#allocation9 + $0x10] sm:$0xff]  ;;  %v980_v47 = vld [vmem:[#allocation9 + $0x20] sm:$0xff] }
 0x102   : > { %4548 = vmatprep.subr.bf16.mxu0 %v4547_v46  ;;  %4580 = vmatprep.subr.bf16.mxu1 %v4579_v8  ;;  %v4611_v45 = vpack.c.bf16 %v979_v42, %v978_v41  ;;  %v4615_v54 = vpack.c.bf16 %v981_v48, %v980_v47  ;;  %v1264_v42 = vld [vmem:[#allocation9 + $0x1a0] sm:$0xff]  ;;  %v1267_v47 = vld [vmem:[#allocation9 + $0x1b8] sm:$0xff] }
 0x104   : > { %4582 = vmatpush3.bf16.msra.mxu1 %v4579_v8  ;;  %v991_v8 = vld [vmem:[#allocation9 + $0x78] sm:$0xff] }
 0x105   : > { %4550 = vmatpush3.bf16.msra.mxu0 %v4547_v46  ;;  %4584 = vmatprep.subr.bf16.mxu1 %v4583_v11  ;;  %v4635_v9 = vpack.c.bf16 %v991_v8, %v990_v7  ;;  %v1362_v7 = vld [vmem:[#allocation9 + $0x230] sm:$0xff]  ;;  %v1363_v8 = vld [vmem:[#allocation9 + $0x238] sm:$0xff] }
 0x106   : > { %4552 = vmatprep.subr.bf16.mxu0 %v4551_v50 }
 0x108   : > { %4586 = vmatpush3.bf16.msra.mxu1 %v4583_v11  ;;  %v1165_v11 = vld [vmem:[#allocation9 + $0x108] sm:$0xff] }
 0x109   : > { %4554 = vmatpush3.bf16.msra.mxu0 %v4551_v50  ;;  %4588 = vmatprep.subr.bf16.mxu1 %v4587_v14  ;;  %v1484_v50 = vld [vmem:[#allocation10 + $0x88] sm:$0xff]  ;;  %v4639_v12 = vpack.c.bf16 %v1165_v11, %v1164_v10  ;;  %v1364_v10 = vld [vmem:[#allocation9 + $0x240] sm:$0xff] }
 0x10a   : > { %4556 = vmatprep.subr.bf16.mxu0 %v4555_v53  ;;  %v4735_v52 = vpack.c.bf16 %v1484_v50, %v1483_v49  ;;  %v1268_v49 = vld [vmem:[#allocation9 + $0x1c0] sm:$0xff]  ;;  %v1269_v50 = vld [vmem:[#allocation9 + $0x1c8] sm:$0xff] }
 0x10b   : > { %v1365_v11 = vld [vmem:[#allocation9 + $0x248] sm:$0xff] }
 0x10c   : > { %4590 = vmatpush3.bf16.msra.mxu1 %v4587_v14  ;;  %v1167_v14 = vld [vmem:[#allocation9 + $0x118] sm:$0xff] }
 0x10d   : > { %4558 = vmatpush3.bf16.msra.mxu0 %v4555_v53  ;;  %4592 = vmatprep.subr.bf16.mxu1 %v4591_v17  ;;  %v1486_v53 = vld [vmem:[#allocation10 + $0x98] sm:$0xff]  ;;  %v4643_v15 = vpack.c.bf16 %v1167_v14, %v1166_v13  ;;  %v1366_v13 = vld [vmem:[#allocation9 + $0x250] sm:$0xff] }
 0x10e   : > { %4560 = vmatprep.subr.bf16.mxu0 %v4559_v56  ;;  %v4739_v55 = vpack.c.bf16 %v1486_v53, %v1485_v51  ;;  %v4687_v51 = vpack.c.bf16 %v1269_v50, %v1268_v49  ;;  %v1271_v53 = vld [vmem:[#allocation9 + $0x1d8] sm:$0xff]  ;;  %v1466_v49 = vld [vmem:[#allocation10 + $0x10] sm:$0xff] }
 0x10f   : > { %v1367_v14 = vld [vmem:[#allocation9 + $0x258] sm:$0xff] }
 0x110   : > { %4594 = vmatpush3.bf16.msra.mxu1 %v4591_v17  ;;  %v1168_v17 = vld [vmem:[#allocation9 + $0x120] sm:$0xff]  ;;  %v1467_v50 = vld [vmem:[#allocation10 + $0x18] sm:$0xff] }
 0x111   : > { %4562 = vmatpush3.bf16.msra.mxu0 %v4559_v56  ;;  %4596 = vmatprep.subr.bf16.mxu1 %v4595_v20  ;;  %v1487_v56 = vld [vmem:[#allocation10 + $0xa0] sm:$0xff]  ;;  %v4647_v19 = vpack.c.bf16 %v1169_v18, %v1168_v17  ;;  %v1369_v17 = vld [vmem:[#allocation9 + $0x268] sm:$0xff] }
 0x112   : > { %4564 = vmatprep.subr.bf16.mxu0 %v4563_v59  ;;  %v4743_v60 = vpack.c.bf16 %v1488_v57, %v1487_v56  ;;  %v1274_v57 = vld [vmem:[#allocation9 + $0x1f0] sm:$0xff] }
 0x114   : > { %4598 = vmatpush3.bf16.msra.mxu1 %v4595_v20  ;;  %v1170_v20 = vld [vmem:[#allocation9 + $0x130] sm:$0xff] }
 0x115   : > { %4566 = vmatpush3.bf16.msra.mxu0 %v4563_v59  ;;  %4600 = vmatprep.subr.bf16.mxu1 %v4599_v23  ;;  %v983_v59 = vld [vmem:[#allocation9 + $0x38] sm:$0xff]  ;;  %v4651_v22 = vpack.c.bf16 %v1171_v21, %v1170_v20 }
 0x116   : > { %4568 = vmatprep.subr.bf16.mxu0 %v4567_v62  ;;  %v4619_v61 = vpack.c.bf16 %v983_v59, %v982_v58  ;;  %v1275_v58 = vld [vmem:[#allocation9 + $0x1f8] sm:$0xff] }
 0x117   : > { %v4699_v59 = vpack.c.bf16 %v1275_v58, %v1274_v57  ;;  %v1371_v20 = vld [vmem:[#allocation9 + $0x278] sm:$0xff]  ;;  %v1972_v57 = vld [vmem:[#allocation12 + $0x88] sm:$0xff]  ;;  %v1973_v58 = vld [vmem:[#allocation12 + $0x90] sm:$0xff] }
 0x118   : > { %4602 = vmatpush3.bf16.msra.mxu1 %v4599_v23  ;;  %v1172_v23 = vld [vmem:[#allocation9 + $0x140] sm:$0xff] }
 0x119   : > { %4570 = vmatpush3.bf16.msra.mxu0 %v4567_v62  ;;  %4604 = vmatprep.subr.bf16.mxu1 %v4603_v26  ;;  %v984_v62 = vld [vmem:[#allocation9 + $0x40] sm:$0xff]  ;;  %v4655_v25 = vpack.c.bf16 %v1173_v24, %v1172_v23  ;;  %v1489_v23 = vld [vmem:[#allocation10 + $0xb0] sm:$0xff]  ;;  %v1490_v24 = vld [vmem:[#allocation10 + $0xb8] sm:$0xff] }
 0x11a   : > { %4572 = vmatprep.subr.bf16.mxu0 %v4571_v1  ;;  %v4623_v0 = vpack.c.bf16 %v985_v63, %v984_v62  ;;  %v1358_v63 = vld [vmem:[#allocation9 + $0x210] sm:$0xff] }
 0x11c   : > { %4606 = vmatpush3.bf16.msra.mxu1 %v4603_v26  ;;  %v1174_v26 = vld [vmem:[#allocation9 + $0x150] sm:$0xff] }
 0x11d   : > { %4574 = vmatpush3.bf16.msra.mxu0 %v4571_v1  ;;  %4608 = vmatprep.subr.bf16.mxu1 %v4607_v29  ;;  %v986_v1 = vld [vmem:[#allocation9 + $0x50] sm:$0xff]  ;;  %v4659_v28 = vpack.c.bf16 %v1175_v27, %v1174_v26  ;;  %v1491_v26 = vld [vmem:[#allocation10 + $0xc0] sm:$0xff]  ;;  %v1492_v27 = vld [vmem:[#allocation10 + $0xc8] sm:$0xff] }
 0x11e   : > { %4736 = vmatprep.subr.bf16.mxu0 %v4735_v52 }
 0x120   : > { %3713 = vmatmul.mubr.f32.vlgmr.msra.gmra.mrb[0].mxu0 %v866_v2  ;;  %v987_v2 = vld [vmem:[#allocation9 + $0x58] sm:$0xff] }
 0x121   : > { %4738 = vmatpush3.bf16.msra.mxu0 %v4735_v52  ;;  %v4627_v3 = vpack.c.bf16 %v987_v2, %v986_v1  ;;  %v1270_v52 = vld [vmem:[#allocation9 + $0x1d0] sm:$0xff] }
 0x122   : > { %4740 = vmatprep.subr.bf16.mxu0 %v4739_v55 }
 0x125   : > { %4742 = vmatpush3.bf16.msra.mxu0 %v4739_v55  ;;  %v1273_v55 = vld [vmem:[#allocation9 + $0x1e8] sm:$0xff] }
 0x126   : > { %4744 = vmatprep.subr.bf16.mxu0 %v4743_v60 }
 0x129   : > { %4746 = vmatpush3.bf16.msra.mxu0 %v4743_v60  ;;  %v1356_v60 = vld [vmem:[#allocation9 + $0x200] sm:$0xff] }
 0x1d2   : > { %v3609_v30 = vpop.f32.mrb[0].mxu1 }
 0x1d3   : > { %v664_v31 = vpop.f32.mrb[1].mxu1 }
 0x1f3   : > { %v3714_v32 = vpop.f32.mrb[0].mxu0 }
 0x1f4   : > { %v5215_v34 = vadd.f32 %v3714_v32, %v3609_v30  ;;  %v950_v35 = vpop.f32.mrb[1].mxu0  ;;  %v1177_v30 = vld [vmem:[#allocation9 + $0x168] sm:$0xff]  ;;  %v1178_v32 = vld [vmem:[#allocation9 + $0x170] sm:$0xff] }
 0x1f5   : > { %v5216_v36 = vadd.f32 %v950_v35, %v664_v31  ;;  %v1260_v35 = vld [vmem:[#allocation9 + $0x180] sm:$0xff] }
 0x1f6   : > { %v969_v37 = vadd.f32 %v5215_v34, %v3078_v33 }
 0x1f7   : > { %v968_v38 = vadd.f32 %v5216_v36, %v3078_v33  ;;  %v1179_v33 = vld [vmem:[#allocation9 + $0x178] sm:$0xff]  ;;  %v1261_v36 = vld [vmem:[#allocation9 + $0x188] sm:$0xff] }
 0x1f8   : > { %5357 = vtanh.f32 %v969_v37  ;;  %v4667_v34 = vpack.c.bf16 %v1179_v33, %v1178_v32  ;;  %v4671_v37 = vpack.c.bf16 %v1261_v36, %v1260_v35  ;;  %v1495_v32 = vld [vmem:[#allocation10 + $0xe0] sm:$0xff]  ;;  %v1496_v33 = vld [vmem:[#allocation10 + $0xe8] sm:$0xff]  ;;  %v1497_v35 = vld [vmem:[#allocation10 + $0xf0] sm:$0xff] }
 0x1f9   : > { %5359 = vtanh.f32 %v968_v38  ;;  %v1262_v38 = vld [vmem:[#allocation9 + $0x190] sm:$0xff]  ;;  %v1498_v36 = vld [vmem:[#allocation10 + $0xf8] sm:$0xff] }
 0x202   : > { %v5977_v39 = vpop.eup %5357 }
 0x203   : > { %v5979_v40 = vpop.eup %5359  ;;  %973 = vst [vmem:[#allocation3 + $0x10] sm:$0xff] %v5977_v39 }
 0x204   : > { %972 = vst [vmem:[#allocation3 + $0x8] sm:$0xff] %v5979_v40 }
 0x20a   : > { %v1258_v2 = vld [vmem:[#allocation3 + $0x11] sm:$0xff] }
 0x20b   : > { %v992_v43 = vld [vmem:[#allocation3 + $0x7] sm:$0xff]  ;;  %v993_v44 = vld [vmem:[#allocation3 + $0xf] sm:$0xff] }
 0x20c   : > { %3747 = vmatprep.mubr.f32.mxu1 %v992_v43  ;;  %v974_v46 = vld [vmem:[#allocation3 + $0x6] sm:$0xff]  ;;  %v975_v16 = vld [vmem:[#allocation3 + $0xe] sm:$0xff] }
 0x20d   : > { %3748 = vmatmul.mubr.f32.vlgmr.msra.gmra.mrb[2].mxu1 %v993_v44  ;;  %v1265_v43 = vld [vmem:[#allocation9 + $0x1a8] sm:$0xff] }
 0x20e   : > { %4610 = vmatpush3.bf16.msra.mxu1 %v4607_v29  ;;  %3782 = vmatprep.mubr.f32.mxu1 %v974_v46  ;;  %v1176_v29 = vld [vmem:[#allocation9 + $0x160] sm:$0xff]  ;;  %v1257_v44 = vld [vmem:[#allocation3 + $0x9] sm:$0xff] }
 0x20f   : > { %4612 = vmatprep.subr.bf16.mxu1 %v4611_v45  ;;  %v4663_v31 = vpack.c.bf16 %v1177_v30, %v1176_v29  ;;  %v1266_v46 = vld [vmem:[#allocation9 + $0x1b0] sm:$0xff]  ;;  %v1494_v30 = vld [vmem:[#allocation10 + $0xd8] sm:$0xff] }
 0x210   : > { %v4683_v48 = vpack.c.bf16 %v1267_v47, %v1266_v46  ;;  %v1353_v5 = vld [vmem:[#allocation3 + $0xa] sm:$0xff] }
 0x211   : > { %v1493_v29 = vld [vmem:[#allocation10 + $0xd0] sm:$0xff] }
 0x212   : > { %4614 = vmatpush3.bf16.msra.mxu1 %v4611_v45  ;;  %v4679_v45 = vpack.c.bf16 %v1265_v43, %v1264_v42  ;;  %v3079_v42 = vld [vmem:[%s6076_s7] ss:$0 sm:$0xff] }
 0x213   : > { %4616 = vmatprep.subr.bf16.mxu1 %v4615_v54 }
 0x216   : > { %4618 = vmatpush3.bf16.msra.mxu1 %v4615_v54  ;;  %v1272_v54 = vld [vmem:[#allocation9 + $0x1e0] sm:$0xff] }
 0x217   : > { %4620 = vmatprep.subr.bf16.mxu1 %v4619_v61  ;;  %v4695_v56 = vpack.c.bf16 %v1273_v55, %v1272_v54  ;;  %v1468_v54 = vld [vmem:[#allocation10 + $0x20] sm:$0xff]  ;;  %v1469_v55 = vld [vmem:[#allocation10 + $0x28] sm:$0xff] }
 0x21a   : > { %4622 = vmatpush3.bf16.msra.mxu1 %v4619_v61  ;;  %v1357_v61 = vld [vmem:[#allocation9 + $0x208] sm:$0xff] }
 0x21b   : > { %4624 = vmatprep.subr.bf16.mxu1 %v4623_v0  ;;  %v4703_v62 = vpack.c.bf16 %v1357_v61, %v1356_v60  ;;  %v1974_v60 = vld [vmem:[#allocation12 + $0x98] sm:$0xff]  ;;  %v4775_v61 = vpack.c.bf16 %v1469_v55, %v1468_v54 }
 0x21c   : > { %v1755_v54 = vld [vmem:[#allocation10 + $0x1b8] sm:$0xff] }
 0x21e   : > { %4626 = vmatpush3.bf16.msra.mxu1 %v4623_v0  ;;  %v1359_v0 = vld [vmem:[#allocation9 + $0x218] sm:$0xff] }
 0x21f   : > { %4628 = vmatprep.subr.bf16.mxu1 %v4627_v3  ;;  %v4707_v1 = vpack.c.bf16 %v1359_v0, %v1358_v63  ;;  %v1975_v63 = vld [vmem:[#allocation12 + $0xa0] sm:$0xff]  ;;  %v1976_v0 = vld [vmem:[#allocation12 + $0xa8] sm:$0xff] }
 0x222   : > { %4630 = vmatpush3.bf16.msra.mxu1 %v4627_v3  ;;  %v1360_v3 = vld [vmem:[#allocation9 + $0x220] sm:$0xff] }
 0x223   : > { %4632 = vmatprep.subr.bf16.mxu1 %v4631_v6 }
 0x226   : > { %4634 = vmatpush3.bf16.msra.mxu1 %v4631_v6  ;;  %v4711_v6 = vpack.c.bf16 %v1361_v4, %v1360_v3  ;;  %v4903_v3 = vpack.c.bf16 %v1976_v0, %v1975_v63  ;;  %v1762_v0 = vld [vmem:[#allocation10 + $0x1f0] sm:$0xff] }
 0x227   : > { %4636 = vmatprep.subr.bf16.mxu1 %v4635_v9 }
 0x22a   : > { %4638 = vmatpush3.bf16.msra.mxu1 %v4635_v9  ;;  %v4715_v9 = vpack.c.bf16 %v1363_v8, %v1362_v7  ;;  %v1474_v8 = vld [vmem:[#allocation10 + $0x50] sm:$0xff] }
 0x22b   : > { %4640 = vmatprep.subr.bf16.mxu1 %v4639_v12 }
 0x22d   : > { %3783 = vmatmul.mubr.f32.vlgmr.msra.gmra.mrb[2].mxu1 %v975_v16  ;;  %v1368_v16 = vld [vmem:[#allocation9 + $0x260] sm:$0xff] }
 0x22e   : > { %4642 = vmatpush3.bf16.msra.mxu1 %v4639_v12  ;;  %3817 = vmatprep.mubr.f32.mxu1 %v5979_v40  ;;  %v1263_v40 = vld [vmem:[#allocation9 + $0x198] sm:$0xff]  ;;  %v4719_v12 = vpack.c.bf16 %v1365_v11, %v1364_v10  ;;  %v4727_v18 = vpack.c.bf16 %v1369_v17, %v1368_v16  ;;  %v1476_v11 = vld [vmem:[#allocation10 + $0x60] sm:$0xff] }
 0x22f   : > { %4644 = vmatprep.subr.bf16.mxu1 %v4643_v15  ;;  %v4675_v41 = vpack.c.bf16 %v1263_v40, %v1262_v38  ;;  %v1464_v38 = vld [vmem:[#allocation10] sm:$0xff]  ;;  %v1465_v40 = vld [vmem:[#allocation10 + $0x8] sm:$0xff] }
 0x230   : > { %v1652_v17 = vld [vmem:[#allocation10 + $0x100] sm:$0xff] }
 0x232   : > { %4646 = vmatpush3.bf16.msra.mxu1 %v4643_v15  ;;  %v4723_v15 = vpack.c.bf16 %v1367_v14, %v1366_v13  ;;  %v1478_v14 = vld [vmem:[#allocation10 + $0x70] sm:$0xff] }
 0x233   : > { %4648 = vmatprep.subr.bf16.mxu1 %v4647_v19 }
 0x236   : > { %4650 = vmatpush3.bf16.msra.mxu1 %v4647_v19  ;;  %v1370_v19 = vld [vmem:[#allocation9 + $0x270] sm:$0xff] }
 0x237   : > { %4652 = vmatprep.subr.bf16.mxu1 %v4651_v22  ;;  %v4731_v21 = vpack.c.bf16 %v1371_v20, %v1370_v19  ;;  %v1654_v20 = vld [vmem:[#allocation10 + $0x110] sm:$0xff] }
 0x23a   : > { %4654 = vmatpush3.bf16.msra.mxu1 %v4651_v22  ;;  %v1354_v22 = vld [vmem:[#allocation3 + $0x12] sm:$0xff] }
 0x23b   : > { %4656 = vmatprep.subr.bf16.mxu1 %v4655_v25 }
 0x23e   : > { %4658 = vmatpush3.bf16.msra.mxu1 %v4655_v25  ;;  %v4747_v25 = vpack.c.bf16 %v1490_v24, %v1489_v23  ;;  %v1656_v24 = vld [vmem:[#allocation10 + $0x120] sm:$0xff] }
 0x23f   : > { %4660 = vmatprep.subr.bf16.mxu1 %v4659_v28 }
 0x240   : > { %4748 = vmatprep.subr.bf16.mxu0 %v4747_v25 }
 0x241   : > { %4750 = vmatpush3.bf16.msra.mxu0 %v4747_v25  ;;  %v1657_v25 = vld [vmem:[#allocation10 + $0x128] sm:$0xff] }
 0x242   : > { %4662 = vmatpush3.bf16.msra.mxu1 %v4659_v28  ;;  %v4751_v28 = vpack.c.bf16 %v1492_v27, %v1491_v26  ;;  %v4807_v26 = vpack.c.bf16 %v1657_v25, %v1656_v24  ;;  %v1658_v27 = vld [vmem:[#allocation10 + $0x130] sm:$0xff]  ;;  %v1857_v24 = vld [vmem:[#allocation10 + $0x268] sm:$0xff] }
 0x243   : > { %4664 = vmatprep.subr.bf16.mxu1 %v4663_v31 }
 0x244   : > { %4752 = vmatprep.subr.bf16.mxu0 %v4751_v28 }
 0x245   : > { %4754 = vmatpush3.bf16.msra.mxu0 %v4751_v28  ;;  %v1659_v28 = vld [vmem:[#allocation10 + $0x138] sm:$0xff] }
 0x246   : > { %4666 = vmatpush3.bf16.msra.mxu1 %v4663_v31  ;;  %v4755_v31 = vpack.c.bf16 %v1494_v30, %v1493_v29  ;;  %v4811_v29 = vpack.c.bf16 %v1659_v28, %v1658_v27  ;;  %v1660_v30 = vld [vmem:[#allocation10 + $0x140] sm:$0xff]  ;;  %v1859_v27 = vld [vmem:[#allocation10 + $0x278] sm:$0xff] }
 0x247   : > { %4668 = vmatprep.subr.bf16.mxu1 %v4667_v34 }
 0x248   : > { %4756 = vmatprep.subr.bf16.mxu0 %v4755_v31 }
 0x249   : > { %4758 = vmatpush3.bf16.msra.mxu0 %v4755_v31  ;;  %v1661_v31 = vld [vmem:[#allocation10 + $0x148] sm:$0xff] }
 0x24a   : > { %4670 = vmatpush3.bf16.msra.mxu1 %v4667_v34  ;;  %v4759_v34 = vpack.c.bf16 %v1496_v33, %v1495_v32  ;;  %v4815_v32 = vpack.c.bf16 %v1661_v31, %v1660_v30  ;;  %v1662_v33 = vld [vmem:[#allocation10 + $0x150] sm:$0xff]  ;;  %v1978_v31 = vld [vmem:[#allocation12 + $0xb8] sm:$0xff] }
 0x24b   : > { %4672 = vmatprep.subr.bf16.mxu1 %v4671_v37  ;;  %v1977_v30 = vld [vmem:[#allocation12 + $0xb0] sm:$0xff] }
 0x24c   : > { %4760 = vmatprep.subr.bf16.mxu0 %v4759_v34 }
 0x24d   : > { %3818 = vmatmul.mubr.f32.vlgmr.msra.gmra.mrb[2].mxu1 %v5977_v39  ;;  %v4691_v39 = vpack.c.bf16 %v1271_v53, %v1270_v52  ;;  %4762 = vmatpush3.bf16.msra.mxu0 %v4759_v34  ;;  %v4771_v53 = vpack.c.bf16 %v1467_v50, %v1466_v49  ;;  %v1663_v34 = vld [vmem:[#allocation10 + $0x158] sm:$0xff]  ;;  %v1752_v50 = vld [vmem:[#allocation10 + $0x1a0] sm:$0xff] }
 0x24e   : > { %4674 = vmatpush3.bf16.msra.mxu1 %v4671_v37  ;;  %3852 = vmatprep.mubr.f32.mxu1 %v1257_v44  ;;  %v4763_v37 = vpack.c.bf16 %v1498_v36, %v1497_v35  ;;  %v4819_v35 = vpack.c.bf16 %v1663_v34, %v1662_v33  ;;  %v1664_v36 = vld [vmem:[#allocation10 + $0x160] sm:$0xff]  ;;  %v1980_v34 = vld [vmem:[#allocation12 + $0xc8] sm:$0xff] }
 0x24f   : > { %4676 = vmatprep.subr.bf16.mxu1 %v4675_v41  ;;  %v1979_v33 = vld [vmem:[#allocation12 + $0xc0] sm:$0xff] }
 0x250   : > { %4764 = vmatprep.subr.bf16.mxu0 %v4763_v37 }
 0x251   : > { %4766 = vmatpush3.bf16.msra.mxu0 %v4763_v37  ;;  %v1665_v37 = vld [vmem:[#allocation10 + $0x168] sm:$0xff] }
 0x252   : > { %4678 = vmatpush3.bf16.msra.mxu1 %v4675_v41  ;;  %v4767_v41 = vpack.c.bf16 %v1465_v40, %v1464_v38  ;;  %v4823_v38 = vpack.c.bf16 %v1665_v37, %v1664_v36  ;;  %v1666_v40 = vld [vmem:[#allocation10 + $0x170] sm:$0xff]  ;;  %v1982_v37 = vld [vmem:[#allocation12 + $0xd8] sm:$0xff] }
 0x253   : > { %4680 = vmatprep.subr.bf16.mxu1 %v4679_v45  ;;  %v1981_v36 = vld [vmem:[#allocation12 + $0xd0] sm:$0xff] }
 0x254   : > { %4768 = vmatprep.subr.bf16.mxu0 %v4767_v41 }
 0x256   : > { %4682 = vmatpush3.bf16.msra.mxu1 %v4679_v45 }
 0x257   : > { %4684 = vmatprep.subr.bf16.mxu1 %v4683_v48 }
 0x25a   : > { %4686 = vmatpush3.bf16.msra.mxu1 %v4683_v48 }
 0x25b   : > { %4688 = vmatprep.subr.bf16.mxu1 %v4687_v51 }
 0x25e   : > { %4690 = vmatpush3.bf16.msra.mxu1 %v4687_v51 }
 0x25f   : > { %4692 = vmatprep.subr.bf16.mxu1 %v4691_v39 }
 0x262   : > { %4694 = vmatpush3.bf16.msra.mxu1 %v4691_v39 }
 0x263   : > { %4696 = vmatprep.subr.bf16.mxu1 %v4695_v56 }
 0x266   : > { %4698 = vmatpush3.bf16.msra.mxu1 %v4695_v56  ;;  %v1971_v56 = vld [vmem:[#allocation12 + $0x80] sm:$0xff] }
 0x267   : > { %4700 = vmatprep.subr.bf16.mxu1 %v4699_v59 }
 0x26a   : > { %4702 = vmatpush3.bf16.msra.mxu1 %v4699_v59  ;;  %v4895_v59 = vpack.c.bf16 %v1972_v57, %v1971_v56  ;;  %v1756_v56 = vld [vmem:[#allocation10 + $0x1c0] sm:$0xff]  ;;  %v1757_v57 = vld [vmem:[#allocation10 + $0x1c8] sm:$0xff] }
 0x26b   : > { %4704 = vmatprep.subr.bf16.mxu1 %v4703_v62 }
 0x26d   : > { %3853 = vmatmul.mubr.f32.vlgmr.msra.gmra.mrb[2].mxu1 %v1258_v2  ;;  %v1471_v2 = vld [vmem:[#allocation10 + $0x38] sm:$0xff] }
 0x26e   : > { %4706 = vmatpush3.bf16.msra.mxu1 %v4703_v62  ;;  %3887 = vmatprep.mubr.f32.mxu1 %v1353_v5  ;;  %v4899_v62 = vpack.c.bf16 %v1974_v60, %v1973_v58  ;;  %v1472_v5 = vld [vmem:[#allocation10 + $0x40] sm:$0xff]  ;;  %v4847_v58 = vpack.c.bf16 %v1757_v57, %v1756_v56  ;;  %v1759_v60 = vld [vmem:[#allocation10 + $0x1d8] sm:$0xff]  ;;  %v1954_v56 = vld [vmem:[#allocation12 + $0x10] sm:$0xff] }
 0x26f   : > { %4708 = vmatprep.subr.bf16.mxu1 %v4707_v1  ;;  %v1955_v57 = vld [vmem:[#allocation12 + $0x18] sm:$0xff] }
 0x272   : > { %4710 = vmatpush3.bf16.msra.mxu1 %v4707_v1  ;;  %v1470_v1 = vld [vmem:[#allocation10 + $0x30] sm:$0xff] }
 0x273   : > { %4712 = vmatprep.subr.bf16.mxu1 %v4711_v6  ;;  %v4779_v4 = vpack.c.bf16 %v1471_v2, %v1470_v1  ;;  %v1763_v1 = vld [vmem:[#allocation10 + $0x1f8] sm:$0xff] }
 0x274   : > { %v4859_v2 = vpack.c.bf16 %v1763_v1, %v1762_v0  ;;  %v2460_v0 = vld [vmem:[#allocation13 + $0x88] sm:$0xff]  ;;  %v2461_v1 = vld [vmem:[#allocation13 + $0x90] sm:$0xff] }
 0x276   : > { %4714 = vmatpush3.bf16.msra.mxu1 %v4711_v6  ;;  %v1473_v6 = vld [vmem:[#allocation10 + $0x48] sm:$0xff] }
 0x277   : > { %4716 = vmatprep.subr.bf16.mxu1 %v4715_v9  ;;  %v4783_v7 = vpack.c.bf16 %v1473_v6, %v1472_v5  ;;  %v1846_v6 = vld [vmem:[#allocation10 + $0x210] sm:$0xff] }
 0x27a   : > { %4718 = vmatpush3.bf16.msra.mxu1 %v4715_v9  ;;  %v1475_v9 = vld [vmem:[#allocation10 + $0x58] sm:$0xff] }
 0x27b   : > { %4720 = vmatprep.subr.bf16.mxu1 %v4719_v12  ;;  %v4787_v10 = vpack.c.bf16 %v1475_v9, %v1474_v8 }
 0x27e   : > { %4722 = vmatpush3.bf16.msra.mxu1 %v4719_v12  ;;  %v1477_v12 = vld [vmem:[#allocation10 + $0x68] sm:$0xff] }
 0x27f   : > { %4724 = vmatprep.subr.bf16.mxu1 %v4723_v15  ;;  %v4791_v13 = vpack.c.bf16 %v1477_v12, %v1476_v11  ;;  %v1849_v11 = vld [vmem:[#allocation10 + $0x228] sm:$0xff] }
 0x282   : > { %4726 = vmatpush3.bf16.msra.mxu1 %v4723_v15  ;;  %v1479_v15 = vld [vmem:[#allocation10 + $0x78] sm:$0xff] }
 0x283   : > { %4728 = vmatprep.subr.bf16.mxu1 %v4727_v18  ;;  %v4795_v16 = vpack.c.bf16 %v1479_v15, %v1478_v14  ;;  %v1850_v14 = vld [vmem:[#allocation10 + $0x230] sm:$0xff]  ;;  %v1851_v15 = vld [vmem:[#allocation10 + $0x238] sm:$0xff] }
 0x286   : > { %4730 = vmatpush3.bf16.msra.mxu1 %v4727_v18  ;;  %v1653_v18 = vld [vmem:[#allocation10 + $0x108] sm:$0xff] }
 0x287   : > { %4732 = vmatprep.subr.bf16.mxu1 %v4731_v21  ;;  %v4799_v19 = vpack.c.bf16 %v1653_v18, %v1652_v17  ;;  %v1852_v17 = vld [vmem:[#allocation10 + $0x240] sm:$0xff]  ;;  %v1853_v18 = vld [vmem:[#allocation10 + $0x248] sm:$0xff] }
 0x28a   : > { %4734 = vmatpush3.bf16.msra.mxu1 %v4731_v21  ;;  %v1655_v21 = vld [vmem:[#allocation10 + $0x118] sm:$0xff] }
 0x28b   : > { %4896 = vmatprep.subr.bf16.mxu1 %v4895_v59 }
 0x28d   : > { %3888 = vmatmul.mubr.f32.vlgmr.msra.gmra.mrb[2].mxu1 %v1354_v22  ;;  %v4803_v22 = vpack.c.bf16 %v1655_v21, %v1654_v20  ;;  %v1854_v20 = vld [vmem:[#allocation10 + $0x250] sm:$0xff]  ;;  %v1855_v21 = vld [vmem:[#allocation10 + $0x258] sm:$0xff] }
 0x28e   : > { %4898 = vmatpush3.bf16.msra.mxu1 %v4895_v59  ;;  %v1758_v59 = vld [vmem:[#allocation10 + $0x1d0] sm:$0xff] }
 0x28f   : > { %4900 = vmatprep.subr.bf16.mxu1 %v4899_v62 }
 0x292   : > { %4902 = vmatpush3.bf16.msra.mxu1 %v4899_v62  ;;  %v1761_v62 = vld [vmem:[#allocation10 + $0x1e8] sm:$0xff] }
 0x293   : > { %4904 = vmatprep.subr.bf16.mxu1 %v4903_v3 }
 0x296   : > { %4906 = vmatpush3.bf16.msra.mxu1 %v4903_v3  ;;  %v1844_v3 = vld [vmem:[#allocation10 + $0x200] sm:$0xff] }
 0x360   : > { %v3889_v43 = vpop.f32.mrb[2].mxu1 }
 0x361   : > { %v1457_v44 = vadd.f32 %v3889_v43, %v3079_v42  ;;  %v1438_v45 = vpop.f32.mrb[3].mxu1  ;;  %v1748_v43 = vld [vmem:[#allocation10 + $0x180] sm:$0xff] }
 0x362   : > { %v1456_v46 = vadd.f32 %v3079_v42, %v1438_v45 }
 0x363   : > { %5361 = vtanh.f32 %v1457_v44  ;;  %v1749_v44 = vld [vmem:[#allocation10 + $0x188] sm:$0xff] }
 0x364   : > { %5363 = vtanh.f32 %v1456_v46  ;;  %v4831_v45 = vpack.c.bf16 %v1749_v44, %v1748_v43  ;;  %v1750_v46 = vld [vmem:[#allocation10 + $0x190] sm:$0xff]  ;;  %v1986_v44 = vld [vmem:[#allocation12 + $0xf8] sm:$0xff] }
 0x365   : > { %v1985_v43 = vld [vmem:[#allocation12 + $0xf0] sm:$0xff] }
 0x36d   : > { %v5988_v47 = vpop.eup %5361 }
 0x36e   : > { %v5990_v48 = vpop.eup %5363  ;;  %1461 = vst [vmem:[#allocation2 + $0x10] sm:$0xff] %v5988_v47 }
 0x36f   : > { %1460 = vst [vmem:[#allocation2 + $0x8] sm:$0xff] %v5990_v48 }
 0x375   : > { %v1746_v9 = vld [vmem:[#allocation2 + $0x11] sm:$0xff] }
 0x376   : > { %v1480_v51 = vld [vmem:[#allocation2 + $0x7] sm:$0xff]  ;;  %v1481_v52 = vld [vmem:[#allocation2 + $0xf] sm:$0xff] }
 0x377   : > { %3922 = vmatprep.mubr.f32.mxu0 %v1480_v51  ;;  %v1462_v39 = vld [vmem:[#allocation2 + $0x6] sm:$0xff]  ;;  %v1463_v23 = vld [vmem:[#allocation2 + $0xe] sm:$0xff] }
 0x378   : > { %3923 = vmatmul.mubr.f32.vlgmr.msra.gmra.mrb[2].mxu0 %v1481_v52  ;;  %v1753_v51 = vld [vmem:[#allocation10 + $0x1a8] sm:$0xff] }
 0x379   : > { %4770 = vmatpush3.bf16.msra.mxu0 %v4767_v41  ;;  %3957 = vmatprep.mubr.f32.mxu0 %v1462_v39  ;;  %v1667_v41 = vld [vmem:[#allocation10 + $0x178] sm:$0xff]  ;;  %v1745_v52 = vld [vmem:[#allocation2 + $0x9] sm:$0xff] }
 0x37a   : > { %4772 = vmatprep.subr.bf16.mxu0 %v4771_v53  ;;  %v4827_v42 = vpack.c.bf16 %v1667_v41, %v1666_v40  ;;  %v1754_v39 = vld [vmem:[#allocation10 + $0x1b0] sm:$0xff]  ;;  %v1983_v40 = vld [vmem:[#allocation12 + $0xe0] sm:$0xff]  ;;  %v1984_v41 = vld [vmem:[#allocation12 + $0xe8] sm:$0xff] }
 0x37b   : > { %v4843_v55 = vpack.c.bf16 %v1755_v54, %v1754_v39  ;;  %v1841_v12 = vld [vmem:[#allocation2 + $0xa] sm:$0xff] }
 0x37d   : > { %4774 = vmatpush3.bf16.msra.mxu0 %v4771_v53  ;;  %v4839_v53 = vpack.c.bf16 %v1753_v51, %v1752_v50  ;;  %v3080_v50 = vld [vmem:[%s6077_s8] ss:$0 sm:$0xff] }
 0x37e   : > { %4776 = vmatprep.subr.bf16.mxu0 %v4775_v61 }
 0x381   : > { %4778 = vmatpush3.bf16.msra.mxu0 %v4775_v61  ;;  %v1760_v61 = vld [vmem:[#allocation10 + $0x1e0] sm:$0xff] }
 0x382   : > { %4780 = vmatprep.subr.bf16.mxu0 %v4779_v4  ;;  %v4855_v63 = vpack.c.bf16 %v1761_v62, %v1760_v61  ;;  %v1956_v61 = vld [vmem:[#allocation12 + $0x20] sm:$0xff]  ;;  %v1957_v62 = vld [vmem:[#allocation12 + $0x28] sm:$0xff] }
 0x385   : > { %4782 = vmatpush3.bf16.msra.mxu0 %v4779_v4  ;;  %v1845_v4 = vld [vmem:[#allocation10 + $0x208] sm:$0xff] }
 0x386   : > { %4784 = vmatprep.subr.bf16.mxu0 %v4783_v7  ;;  %v4863_v5 = vpack.c.bf16 %v1845_v4, %v1844_v3  ;;  %v2462_v3 = vld [vmem:[#allocation13 + $0x98] sm:$0xff]  ;;  %v4935_v4 = vpack.c.bf16 %v1957_v62, %v1956_v61 }
 0x387   : > { %v2243_v61 = vld [vmem:[#allocation12 + $0x1b8] sm:$0xff] }
 0x389   : > { %4786 = vmatpush3.bf16.msra.mxu0 %v4783_v7  ;;  %v1847_v7 = vld [vmem:[#allocation10 + $0x218] sm:$0xff] }
 0x38a   : > { %4788 = vmatprep.subr.bf16.mxu0 %v4787_v10  ;;  %v4867_v8 = vpack.c.bf16 %v1847_v7, %v1846_v6  ;;  %v2463_v6 = vld [vmem:[#allocation13 + $0xa0] sm:$0xff]  ;;  %v2464_v7 = vld [vmem:[#allocation13 + $0xa8] sm:$0xff] }
 0x38d   : > { %4790 = vmatpush3.bf16.msra.mxu0 %v4787_v10  ;;  %v1848_v10 = vld [vmem:[#allocation10 + $0x220] sm:$0xff] }
 0x38e   : > { %4792 = vmatprep.subr.bf16.mxu0 %v4791_v13 }
 0x391   : > { %4794 = vmatpush3.bf16.msra.mxu0 %v4791_v13  ;;  %v4871_v13 = vpack.c.bf16 %v1849_v11, %v1848_v10  ;;  %v5063_v10 = vpack.c.bf16 %v2464_v7, %v2463_v6  ;;  %v2250_v7 = vld [vmem:[#allocation12 + $0x1f0] sm:$0xff] }
 0x392   : > { %4796 = vmatprep.subr.bf16.mxu0 %v4795_v16 }
 0x395   : > { %4798 = vmatpush3.bf16.msra.mxu0 %v4795_v16  ;;  %v4875_v16 = vpack.c.bf16 %v1851_v15, %v1850_v14  ;;  %v1962_v15 = vld [vmem:[#allocation12 + $0x50] sm:$0xff] }
 0x396   : > { %4800 = vmatprep.subr.bf16.mxu0 %v4799_v19 }
 0x398   : > { %3958 = vmatmul.mubr.f32.vlgmr.msra.gmra.mrb[2].mxu0 %v1463_v23  ;;  %v1856_v23 = vld [vmem:[#allocation10 + $0x260] sm:$0xff] }
 0x399   : > { %4802 = vmatpush3.bf16.msra.mxu0 %v4799_v19  ;;  %3992 = vmatprep.mubr.f32.mxu0 %v5990_v48  ;;  %v1751_v48 = vld [vmem:[#allocation10 + $0x198] sm:$0xff]  ;;  %v4879_v19 = vpack.c.bf16 %v1853_v18, %v1852_v17  ;;  %v4887_v25 = vpack.c.bf16 %v1857_v24, %v1856_v23  ;;  %v1964_v18 = vld [vmem:[#allocation12 + $0x60] sm:$0xff] }
 0x39a   : > { %4804 = vmatprep.subr.bf16.mxu0 %v4803_v22  ;;  %v4835_v49 = vpack.c.bf16 %v1751_v48, %v1750_v46  ;;  %v1952_v46 = vld [vmem:[#allocation12] sm:$0xff]  ;;  %v1953_v48 = vld [vmem:[#allocation12 + $0x8] sm:$0xff] }
 0x39b   : > { %v2140_v24 = vld [vmem:[#allocation12 + $0x100] sm:$0xff] }
 0x39d   : > { %4806 = vmatpush3.bf16.msra.mxu0 %v4803_v22  ;;  %v4883_v22 = vpack.c.bf16 %v1855_v21, %v1854_v20  ;;  %v1966_v21 = vld [vmem:[#allocation12 + $0x70] sm:$0xff] }
 0x39e   : > { %4808 = vmatprep.subr.bf16.mxu0 %v4807_v26 }
 0x3a1   : > { %4810 = vmatpush3.bf16.msra.mxu0 %v4807_v26  ;;  %v1858_v26 = vld [vmem:[#allocation10 + $0x270] sm:$0xff] }
 0x3a2   : > { %4812 = vmatprep.subr.bf16.mxu0 %v4811_v29  ;;  %v4891_v28 = vpack.c.bf16 %v1859_v27, %v1858_v26  ;;  %v2142_v27 = vld [vmem:[#allocation12 + $0x110] sm:$0xff] }
 0x3a5   : > { %4814 = vmatpush3.bf16.msra.mxu0 %v4811_v29  ;;  %v1842_v29 = vld [vmem:[#allocation2 + $0x12] sm:$0xff] }
 0x3a6   : > { %4816 = vmatprep.subr.bf16.mxu0 %v4815_v32 }
 0x3a9   : > { %4818 = vmatpush3.bf16.msra.mxu0 %v4815_v32  ;;  %v4907_v32 = vpack.c.bf16 %v1978_v31, %v1977_v30  ;;  %v2144_v31 = vld [vmem:[#allocation12 + $0x120] sm:$0xff] }
 0x3aa   : > { %4820 = vmatprep.subr.bf16.mxu0 %v4819_v35 }
 0x3ab   : > { %4908 = vmatprep.subr.bf16.mxu1 %v4907_v32 }
 0x3ac   : > { %4910 = vmatpush3.bf16.msra.mxu1 %v4907_v32  ;;  %v2145_v32 = vld [vmem:[#allocation12 + $0x128] sm:$0xff] }
 0x3ad   : > { %4822 = vmatpush3.bf16.msra.mxu0 %v4819_v35  ;;  %v4911_v35 = vpack.c.bf16 %v1980_v34, %v1979_v33  ;;  %v4967_v33 = vpack.c.bf16 %v2145_v32, %v2144_v31  ;;  %v2146_v34 = vld [vmem:[#allocation12 + $0x130] sm:$0xff]  ;;  %v2345_v31 = vld [vmem:[#allocation12 + $0x268] sm:$0xff] }
 0x3ae   : > { %4824 = vmatprep.subr.bf16.mxu0 %v4823_v38 }
 0x3af   : > { %4912 = vmatprep.subr.bf16.mxu1 %v4911_v35 }
 0x3b0   : > { %4914 = vmatpush3.bf16.msra.mxu1 %v4911_v35  ;;  %v2147_v35 = vld [vmem:[#allocation12 + $0x138] sm:$0xff] }
 0x3b1   : > { %4826 = vmatpush3.bf16.msra.mxu0 %v4823_v38  ;;  %v4915_v38 = vpack.c.bf16 %v1982_v37, %v1981_v36  ;;  %v4971_v36 = vpack.c.bf16 %v2147_v35, %v2146_v34  ;;  %v2148_v37 = vld [vmem:[#allocation12 + $0x140] sm:$0xff]  ;;  %v2347_v34 = vld [vmem:[#allocation12 + $0x278] sm:$0xff] }
 0x3b2   : > { %4828 = vmatprep.subr.bf16.mxu0 %v4827_v42 }
 0x3b3   : > { %4916 = vmatprep.subr.bf16.mxu1 %v4915_v38 }
 0x3b4   : > { %4918 = vmatpush3.bf16.msra.mxu1 %v4915_v38  ;;  %v2149_v38 = vld [vmem:[#allocation12 + $0x148] sm:$0xff] }
 0x3b5   : > { %4830 = vmatpush3.bf16.msra.mxu0 %v4827_v42  ;;  %v4919_v42 = vpack.c.bf16 %v1984_v41, %v1983_v40  ;;  %v4975_v40 = vpack.c.bf16 %v2149_v38, %v2148_v37  ;;  %v2150_v41 = vld [vmem:[#allocation12 + $0x150] sm:$0xff]  ;;  %v2466_v38 = vld [vmem:[#allocation13 + $0xb8] sm:$0xff] }
 0x3b6   : > { %4832 = vmatprep.subr.bf16.mxu0 %v4831_v45  ;;  %v2465_v37 = vld [vmem:[#allocation13 + $0xb0] sm:$0xff] }
 0x3b7   : > { %4920 = vmatprep.subr.bf16.mxu1 %v4919_v42 }
 0x3b8   : > { %3993 = vmatmul.mubr.f32.vlgmr.msra.gmra.mrb[2].mxu0 %v5988_v47  ;;  %v4851_v47 = vpack.c.bf16 %v1759_v60, %v1758_v59  ;;  %4922 = vmatpush3.bf16.msra.mxu1 %v4919_v42  ;;  %v4931_v60 = vpack.c.bf16 %v1955_v57, %v1954_v56  ;;  %v2151_v42 = vld [vmem:[#allocation12 + $0x158] sm:$0xff]  ;;  %v2240_v57 = vld [vmem:[#allocation12 + $0x1a0] sm:$0xff] }
 0x3b9   : > { %4834 = vmatpush3.bf16.msra.mxu0 %v4831_v45  ;;  %4027 = vmatprep.mubr.f32.mxu0 %v1745_v52  ;;  %v4923_v45 = vpack.c.bf16 %v1986_v44, %v1985_v43  ;;  %v4979_v43 = vpack.c.bf16 %v2151_v42, %v2150_v41  ;;  %v2152_v44 = vld [vmem:[#allocation12 + $0x160] sm:$0xff]  ;;  %v2468_v42 = vld [vmem:[#allocation13 + $0xc8] sm:$0xff] }
 0x3ba   : > { %4836 = vmatprep.subr.bf16.mxu0 %v4835_v49  ;;  %v2467_v41 = vld [vmem:[#allocation13 + $0xc0] sm:$0xff] }
 0x3bb   : > { %4924 = vmatprep.subr.bf16.mxu1 %v4923_v45 }
 0x3bc   : > { %4926 = vmatpush3.bf16.msra.mxu1 %v4923_v45  ;;  %v2153_v45 = vld [vmem:[#allocation12 + $0x168] sm:$0xff] }
 0x3bd   : > { %4838 = vmatpush3.bf16.msra.mxu0 %v4835_v49  ;;  %v4927_v49 = vpack.c.bf16 %v1953_v48, %v1952_v46  ;;  %v4983_v46 = vpack.c.bf16 %v2153_v45, %v2152_v44  ;;  %v2154_v48 = vld [vmem:[#allocation12 + $0x170] sm:$0xff]  ;;  %v2470_v45 = vld [vmem:[#allocation13 + $0xd8] sm:$0xff] }
 0x3be   : > { %4840 = vmatprep.subr.bf16.mxu0 %v4839_v53  ;;  %v2469_v44 = vld [vmem:[#allocation13 + $0xd0] sm:$0xff] }
 0x3bf   : > { %4928 = vmatprep.subr.bf16.mxu1 %v4927_v49 }
 0x3c1   : > { %4842 = vmatpush3.bf16.msra.mxu0 %v4839_v53 }
 0x3c2   : > { %4844 = vmatprep.subr.bf16.mxu0 %v4843_v55 }
 0x3c5   : > { %4846 = vmatpush3.bf16.msra.mxu0 %v4843_v55 }
 0x3c6   : > { %4848 = vmatprep.subr.bf16.mxu0 %v4847_v58 }
 0x3c9   : > { %4850 = vmatpush3.bf16.msra.mxu0 %v4847_v58 }
 0x3ca   : > { %4852 = vmatprep.subr.bf16.mxu0 %v4851_v47 }
 0x3cd   : > { %4854 = vmatpush3.bf16.msra.mxu0 %v4851_v47 }
 0x3ce   : > { %4856 = vmatprep.subr.bf16.mxu0 %v4855_v63 }
 0x3d1   : > { %4858 = vmatpush3.bf16.msra.mxu0 %v4855_v63  ;;  %v2459_v63 = vld [vmem:[#allocation13 + $0x80] sm:$0xff] }
 0x3d2   : > { %4860 = vmatprep.subr.bf16.mxu0 %v4859_v2 }
 0x3d5   : > { %4862 = vmatpush3.bf16.msra.mxu0 %v4859_v2  ;;  %v5055_v2 = vpack.c.bf16 %v2460_v0, %v2459_v63  ;;  %v2244_v63 = vld [vmem:[#allocation12 + $0x1c0] sm:$0xff]  ;;  %v2245_v0 = vld [vmem:[#allocation12 + $0x1c8] sm:$0xff] }
 0x3d6   : > { %4864 = vmatprep.subr.bf16.mxu0 %v4863_v5 }
 0x3d8   : > { %4028 = vmatmul.mubr.f32.vlgmr.msra.gmra.mrb[2].mxu0 %v1746_v9  ;;  %v1959_v9 = vld [vmem:[#allocation12 + $0x38] sm:$0xff] }
 0x3d9   : > { %4866 = vmatpush3.bf16.msra.mxu0 %v4863_v5  ;;  %4062 = vmatprep.mubr.f32.mxu0 %v1841_v12  ;;  %v5059_v5 = vpack.c.bf16 %v2462_v3, %v2461_v1  ;;  %v1960_v12 = vld [vmem:[#allocation12 + $0x40] sm:$0xff]  ;;  %v5007_v1 = vpack.c.bf16 %v2245_v0, %v2244_v63  ;;  %v2247_v3 = vld [vmem:[#allocation12 + $0x1d8] sm:$0xff]  ;;  %v2442_v63 = vld [vmem:[#allocation13 + $0x10] sm:$0xff] }
 0x3da   : > { %4868 = vmatprep.subr.bf16.mxu0 %v4867_v8  ;;  %v2443_v0 = vld [vmem:[#allocation13 + $0x18] sm:$0xff] }
 0x3dd   : > { %4870 = vmatpush3.bf16.msra.mxu0 %v4867_v8  ;;  %v1958_v8 = vld [vmem:[#allocation12 + $0x30] sm:$0xff] }
 0x3de   : > { %4872 = vmatprep.subr.bf16.mxu0 %v4871_v13  ;;  %v4939_v11 = vpack.c.bf16 %v1959_v9, %v1958_v8  ;;  %v2251_v8 = vld [vmem:[#allocation12 + $0x1f8] sm:$0xff] }
 0x3df   : > { %v5019_v9 = vpack.c.bf16 %v2251_v8, %v2250_v7  ;;  %v2446_v7 = vld [vmem:[#allocation13 + $0x30] sm:$0xff]  ;;  %v2447_v8 = vld [vmem:[#allocation13 + $0x38] sm:$0xff] }
 0x3e1   : > { %4874 = vmatpush3.bf16.msra.mxu0 %v4871_v13  ;;  %v1961_v13 = vld [vmem:[#allocation12 + $0x48] sm:$0xff] }
 0x3e2   : > { %4876 = vmatprep.subr.bf16.mxu0 %v4875_v16  ;;  %v4943_v14 = vpack.c.bf16 %v1961_v13, %v1960_v12  ;;  %v2334_v13 = vld [vmem:[#allocation12 + $0x210] sm:$0xff] }
 0x3e5   : > { %4878 = vmatpush3.bf16.msra.mxu0 %v4875_v16  ;;  %v1963_v16 = vld [vmem:[#allocation12 + $0x58] sm:$0xff] }
 0x3e6   : > { %4880 = vmatprep.subr.bf16.mxu0 %v4879_v19  ;;  %v4947_v17 = vpack.c.bf16 %v1963_v16, %v1962_v15 }
 0x3e9   : > { %4882 = vmatpush3.bf16.msra.mxu0 %v4879_v19  ;;  %v1965_v19 = vld [vmem:[#allocation12 + $0x68] sm:$0xff] }
 0x3ea   : > { %4884 = vmatprep.subr.bf16.mxu0 %v4883_v22  ;;  %v4951_v20 = vpack.c.bf16 %v1965_v19, %v1964_v18  ;;  %v2337_v18 = vld [vmem:[#allocation12 + $0x228] sm:$0xff] }
 0x3ed   : > { %4886 = vmatpush3.bf16.msra.mxu0 %v4883_v22  ;;  %v1967_v22 = vld [vmem:[#allocation12 + $0x78] sm:$0xff] }
 0x3ee   : > { %4888 = vmatprep.subr.bf16.mxu0 %v4887_v25  ;;  %v4955_v23 = vpack.c.bf16 %v1967_v22, %v1966_v21  ;;  %v2338_v21 = vld [vmem:[#allocation12 + $0x230] sm:$0xff]  ;;  %v2339_v22 = vld [vmem:[#allocation12 + $0x238] sm:$0xff] }
 0x3f1   : > { %4890 = vmatpush3.bf16.msra.mxu0 %v4887_v25  ;;  %v2141_v25 = vld [vmem:[#allocation12 + $0x108] sm:$0xff] }
 0x3f2   : > { %4892 = vmatprep.subr.bf16.mxu0 %v4891_v28  ;;  %v4959_v26 = vpack.c.bf16 %v2141_v25, %v2140_v24  ;;  %v2340_v24 = vld [vmem:[#allocation12 + $0x240] sm:$0xff]  ;;  %v2341_v25 = vld [vmem:[#allocation12 + $0x248] sm:$0xff] }
 0x3f5   : > { %4894 = vmatpush3.bf16.msra.mxu0 %v4891_v28  ;;  %v2143_v28 = vld [vmem:[#allocation12 + $0x118] sm:$0xff] }
 0x3f6   : > { %5056 = vmatprep.subr.bf16.mxu0 %v5055_v2 }
 0x3f8   : > { %4063 = vmatmul.mubr.f32.vlgmr.msra.gmra.mrb[2].mxu0 %v1842_v29  ;;  %v4963_v29 = vpack.c.bf16 %v2143_v28, %v2142_v27  ;;  %v2342_v27 = vld [vmem:[#allocation12 + $0x250] sm:$0xff]  ;;  %v2343_v28 = vld [vmem:[#allocation12 + $0x258] sm:$0xff] }
 0x3f9   : > { %5058 = vmatpush3.bf16.msra.mxu0 %v5055_v2  ;;  %v2246_v2 = vld [vmem:[#allocation12 + $0x1d0] sm:$0xff] }
 0x3fa   : > { %5060 = vmatprep.subr.bf16.mxu0 %v5059_v5 }
 0x3fd   : > { %5062 = vmatpush3.bf16.msra.mxu0 %v5059_v5  ;;  %v2249_v5 = vld [vmem:[#allocation12 + $0x1e8] sm:$0xff] }
 0x3fe   : > { %5064 = vmatprep.subr.bf16.mxu0 %v5063_v10 }
 0x401   : > { %5066 = vmatpush3.bf16.msra.mxu0 %v5063_v10  ;;  %v2332_v10 = vld [vmem:[#allocation12 + $0x200] sm:$0xff] }
 0x4cb   : > { %v4064_v51 = vpop.f32.mrb[2].mxu0 }
 0x4cc   : > { %v1945_v52 = vadd.f32 %v4064_v51, %v3080_v50  ;;  %v1926_v53 = vpop.f32.mrb[3].mxu0  ;;  %v2236_v51 = vld [vmem:[#allocation12 + $0x180] sm:$0xff] }
 0x4cd   : > { %v1944_v39 = vadd.f32 %v3080_v50, %v1926_v53 }
 0x4ce   : > { %5365 = vtanh.f32 %v1945_v52  ;;  %v2237_v52 = vld [vmem:[#allocation12 + $0x188] sm:$0xff] }
 0x4cf   : > { %5367 = vtanh.f32 %v1944_v39  ;;  %v4991_v53 = vpack.c.bf16 %v2237_v52, %v2236_v51  ;;  %v2238_v39 = vld [vmem:[#allocation12 + $0x190] sm:$0xff]  ;;  %v2474_v52 = vld [vmem:[#allocation13 + $0xf8] sm:$0xff] }
 0x4d0   : > { %v2473_v51 = vld [vmem:[#allocation13 + $0xf0] sm:$0xff] }
 0x4d8   : > { %v5999_v54 = vpop.eup %5365 }
 0x4d9   : > { %v6001_v55 = vpop.eup %5367  ;;  %1949 = vst [vmem:[#allocation3 + $0x10] sm:$0xff] %v5999_v54 }
 0x4da   : > { %1948 = vst [vmem:[#allocation3 + $0x8] sm:$0xff] %v6001_v55 }
 0x4e0   : > { %v2234_v16 = vld [vmem:[#allocation3 + $0x11] sm:$0xff] }
 0x4e1   : > { %v1968_v58 = vld [vmem:[#allocation3 + $0x7] sm:$0xff]  ;;  %v1969_v59 = vld [vmem:[#allocation3 + $0xf] sm:$0xff] }
 0x4e2   : > { %4097 = vmatprep.mubr.f32.mxu1 %v1968_v58  ;;  %v1950_v47 = vld [vmem:[#allocation3 + $0x6] sm:$0xff]  ;;  %v1951_v30 = vld [vmem:[#allocation3 + $0xe] sm:$0xff] }
 0x4e3   : > { %4098 = vmatmul.mubr.f32.vlgmr.msra.gmra.mrb[4].mxu1 %v1969_v59  ;;  %v2241_v58 = vld [vmem:[#allocation12 + $0x1a8] sm:$0xff] }
 0x4e4   : > { %4930 = vmatpush3.bf16.msra.mxu1 %v4927_v49  ;;  %4132 = vmatprep.mubr.f32.mxu1 %v1950_v47  ;;  %v2155_v49 = vld [vmem:[#allocation12 + $0x178] sm:$0xff]  ;;  %v2233_v59 = vld [vmem:[#allocation3 + $0x9] sm:$0xff] }
 0x4e5   : > { %4932 = vmatprep.subr.bf16.mxu1 %v4931_v60  ;;  %v4987_v50 = vpack.c.bf16 %v2155_v49, %v2154_v48  ;;  %v2242_v47 = vld [vmem:[#allocation12 + $0x1b0] sm:$0xff]  ;;  %v2471_v48 = vld [vmem:[#allocation13 + $0xe0] sm:$0xff]  ;;  %v2472_v49 = vld [vmem:[#allocation13 + $0xe8] sm:$0xff] }
 0x4e6   : > { %v5003_v62 = vpack.c.bf16 %v2243_v61, %v2242_v47  ;;  %v2329_v19 = vld [vmem:[#allocation3 + $0xa] sm:$0xff] }
 0x4e8   : > { %4934 = vmatpush3.bf16.msra.mxu1 %v4931_v60  ;;  %v4999_v60 = vpack.c.bf16 %v2241_v58, %v2240_v57  ;;  %v3081_v57 = vld [vmem:[%s6107_s22] ss:$0 sm:$0xff]  ;;  %s5547_s22 = sshll.u32 %s5632_s23, 4  ;;  %s5548_s22 = int_to_ptr.vmem [resolvable:$false] %s5547_s22 }
 0x4e9   : > { %4936 = vmatprep.subr.bf16.mxu1 %v4935_v4  ;;  %s5549_s27 = scalar_lea.vmem %s5548_s22, 512  ;;  %p5550_p13 = scmp.lt.s32.totalorder %s6020_s15, %s5548_s22 }
 0x4ea   : > { %p5551_p0 = scmp.lt.s32.totalorder %s5549_s27, %s5543_s28 }
 0x4ec   : > { %4938 = vmatpush3.bf16.msra.mxu1 %v4935_v4  ;;  %v2248_v4 = vld [vmem:[#allocation12 + $0x1e0] sm:$0xff]  ;;  %p5552_p2 = por %p5551_p0, %p5550_p13 }
 0x4ed   : > { %4940 = vmatprep.subr.bf16.mxu1 %v4939_v11  ;;  %v5015_v6 = vpack.c.bf16 %v2249_v5, %v2248_v4  ;;  %v2445_v4 = vld [vmem:[#allocation13 + $0x28] sm:$0xff] }
 0x4ee   : > { %p5553_p8 = pnand %p5552_p2, %p5546_p1 }
 0x4f0   : > { %4942 = vmatpush3.bf16.msra.mxu1 %v4939_v11  ;;  %v2333_v11 = vld [vmem:[#allocation12 + $0x208] sm:$0xff] }
 0x4f1   : > { %4944 = vmatprep.subr.bf16.mxu1 %v4943_v14  ;;  %v5023_v12 = vpack.c.bf16 %v2333_v11, %v2332_v10  ;;  %v2448_v10 = vld [vmem:[#allocation13 + $0x40] sm:$0xff]  ;;  %v2449_v11 = vld [vmem:[#allocation13 + $0x48] sm:$0xff] }
 0x4f4   : > { %4946 = vmatpush3.bf16.msra.mxu1 %v4943_v14  ;;  %v2335_v14 = vld [vmem:[#allocation12 + $0x218] sm:$0xff] }
 0x4f5   : > { %4948 = vmatprep.subr.bf16.mxu1 %v4947_v17  ;;  %v5027_v15 = vpack.c.bf16 %v2335_v14, %v2334_v13  ;;  %v2450_v13 = vld [vmem:[#allocation13 + $0x50] sm:$0xff]  ;;  %v2451_v14 = vld [vmem:[#allocation13 + $0x58] sm:$0xff] }
 0x4f8   : > { %4950 = vmatpush3.bf16.msra.mxu1 %v4947_v17  ;;  %v2336_v17 = vld [vmem:[#allocation12 + $0x220] sm:$0xff] }
 0x4f9   : > { %4952 = vmatprep.subr.bf16.mxu1 %v4951_v20 }
 0x4fc   : > { %4954 = vmatpush3.bf16.msra.mxu1 %v4951_v20  ;;  %v5031_v20 = vpack.c.bf16 %v2337_v18, %v2336_v17  ;;  %v2453_v17 = vld [vmem:[#allocation13 + $0x68] sm:$0xff] }
 0x4fd   : > { %4956 = vmatprep.subr.bf16.mxu1 %v4955_v23 }
 0x500   : > { %4958 = vmatpush3.bf16.msra.mxu1 %v4955_v23  ;;  %v5035_v23 = vpack.c.bf16 %v2339_v22, %v2338_v21  ;;  %v2628_v22 = vld [vmem:[#allocation13 + $0x100] sm:$0xff] }
 0x501   : > { %4960 = vmatprep.subr.bf16.mxu1 %v4959_v26 }
 0x503   : > { %4133 = vmatmul.mubr.f32.vlgmr.msra.gmra.mrb[4].mxu1 %v1951_v30  ;;  %v2344_v30 = vld [vmem:[#allocation12 + $0x260] sm:$0xff] }
 0x504   : > { %4962 = vmatpush3.bf16.msra.mxu1 %v4959_v26  ;;  %4167 = vmatprep.mubr.f32.mxu1 %v6001_v55  ;;  %v2239_v55 = vld [vmem:[#allocation12 + $0x198] sm:$0xff]  ;;  %v5039_v26 = vpack.c.bf16 %v2341_v25, %v2340_v24  ;;  %v5047_v32 = vpack.c.bf16 %v2345_v31, %v2344_v30  ;;  %v2630_v25 = vld [vmem:[#allocation13 + $0x110] sm:$0xff]  ;;  %v2633_v30 = vld [vmem:[#allocation13 + $0x128] sm:$0xff] }
 0x505   : > { %4964 = vmatprep.subr.bf16.mxu1 %v4963_v29  ;;  %v4995_v56 = vpack.c.bf16 %v2239_v55, %v2238_v39  ;;  %v2440_v39 = vld [vmem:[#allocation13] sm:$0xff]  ;;  %v2441_v55 = vld [vmem:[#allocation13 + $0x8] sm:$0xff] }
 0x508   : > { %4966 = vmatpush3.bf16.msra.mxu1 %v4963_v29  ;;  %v5043_v29 = vpack.c.bf16 %v2343_v28, %v2342_v27 }
 0x509   : > { %4968 = vmatprep.subr.bf16.mxu1 %v4967_v33 }
 0x50c   : > { %4970 = vmatpush3.bf16.msra.mxu1 %v4967_v33  ;;  %v2346_v33 = vld [vmem:[#allocation12 + $0x270] sm:$0xff] }
 0x50d   : > { %4972 = vmatprep.subr.bf16.mxu1 %v4971_v36  ;;  %v5051_v35 = vpack.c.bf16 %v2347_v34, %v2346_v33  ;;  %v2635_v33 = vld [vmem:[#allocation13 + $0x138] sm:$0xff] }
 0x510   : > { %4974 = vmatpush3.bf16.msra.mxu1 %v4971_v36  ;;  %v2330_v36 = vld [vmem:[#allocation3 + $0x12] sm:$0xff] }
 0x511   : > { %4976 = vmatprep.subr.bf16.mxu1 %v4975_v40 }
 0x514   : > { %4978 = vmatpush3.bf16.msra.mxu1 %v4975_v40  ;;  %v5067_v40 = vpack.c.bf16 %v2466_v38, %v2465_v37  ;;  %v2638_v38 = vld [vmem:[#allocation13 + $0x150] sm:$0xff] }
 0x515   : > { %4980 = vmatprep.subr.bf16.mxu1 %v4979_v43 }
 0x516   : > { %5068 = vmatprep.subr.bf16.mxu0 %v5067_v40 }
 0x517   : > { %5070 = vmatpush3.bf16.msra.mxu0 %v5067_v40  ;;  %v2639_v40 = vld [vmem:[#allocation13 + $0x158] sm:$0xff] }
 0x518   : > { %4982 = vmatpush3.bf16.msra.mxu1 %v4979_v43  ;;  %v5071_v43 = vpack.c.bf16 %v2468_v42, %v2467_v41  ;;  %v5139_v41 = vpack.c.bf16 %v2639_v40, %v2638_v38  ;;  %v2640_v42 = vld [vmem:[#allocation13 + $0x160] sm:$0xff] }
 0x519   : > { %4984 = vmatprep.subr.bf16.mxu1 %v4983_v46 }
 0x51a   : > { %5072 = vmatprep.subr.bf16.mxu0 %v5071_v43 }
 0x51b   : > { %5074 = vmatpush3.bf16.msra.mxu0 %v5071_v43  ;;  %v2641_v43 = vld [vmem:[#allocation13 + $0x168] sm:$0xff] }
 0x51c   : > { %4986 = vmatpush3.bf16.msra.mxu1 %v4983_v46  ;;  %v5075_v46 = vpack.c.bf16 %v2470_v45, %v2469_v44  ;;  %v5143_v44 = vpack.c.bf16 %v2641_v43, %v2640_v42  ;;  %v2642_v45 = vld [vmem:[#allocation13 + $0x170] sm:$0xff] }
 0x51d   : > { %4988 = vmatprep.subr.bf16.mxu1 %v4987_v50 }
 0x51e   : > { %5076 = vmatprep.subr.bf16.mxu0 %v5075_v46 }
 0x51f   : > { %5078 = vmatpush3.bf16.msra.mxu0 %v5075_v46  ;;  %v2643_v46 = vld [vmem:[#allocation13 + $0x178] sm:$0xff] }
 0x520   : > { %4990 = vmatpush3.bf16.msra.mxu1 %v4987_v50  ;;  %v5079_v50 = vpack.c.bf16 %v2472_v49, %v2471_v48  ;;  %v5147_v48 = vpack.c.bf16 %v2643_v46, %v2642_v45  ;;  %v2724_v49 = vld [vmem:[#allocation13 + $0x180] sm:$0xff] }
 0x521   : > { %4992 = vmatprep.subr.bf16.mxu1 %v4991_v53 }
 0x522   : > { %5080 = vmatprep.subr.bf16.mxu0 %v5079_v50 }
 0x523   : > { %4168 = vmatmul.mubr.f32.vlgmr.msra.gmra.mrb[4].mxu1 %v5999_v54  ;;  %v5011_v54 = vpack.c.bf16 %v2247_v3, %v2246_v2  ;;  %5082 = vmatpush3.bf16.msra.mxu0 %v5079_v50  ;;  %v5091_v3 = vpack.c.bf16 %v2443_v0, %v2442_v63  ;;  %v2725_v50 = vld [vmem:[#allocation13 + $0x188] sm:$0xff] }
 0x524   : > { %4994 = vmatpush3.bf16.msra.mxu1 %v4991_v53  ;;  %4202 = vmatprep.mubr.f32.mxu1 %v2233_v59  ;;  %v5083_v53 = vpack.c.bf16 %v2474_v52, %v2473_v51  ;;  %v5151_v51 = vpack.c.bf16 %v2725_v50, %v2724_v49  ;;  %v2726_v52 = vld [vmem:[#allocation13 + $0x190] sm:$0xff]  ;;  %v2733_v63 = vld [vmem:[#allocation13 + $0x1c8] sm:$0xff] }
 0x525   : > { %4996 = vmatprep.subr.bf16.mxu1 %v4995_v56 }
 0x526   : > { %5084 = vmatprep.subr.bf16.mxu0 %v5083_v53 }
 0x527   : > { %5086 = vmatpush3.bf16.msra.mxu0 %v5083_v53  ;;  %v2727_v53 = vld [vmem:[#allocation13 + $0x198] sm:$0xff] }
 0x528   : > { %4998 = vmatpush3.bf16.msra.mxu1 %v4995_v56  ;;  %v5087_v56 = vpack.c.bf16 %v2441_v55, %v2440_v39  ;;  %v5155_v39 = vpack.c.bf16 %v2727_v53, %v2726_v52  ;;  %v2728_v55 = vld [vmem:[#allocation13 + $0x1a0] sm:$0xff] }
 0x529   : > { %5000 = vmatprep.subr.bf16.mxu1 %v4999_v60 }
 0x52a   : > { %5088 = vmatprep.subr.bf16.mxu0 %v5087_v56 }
 0x52c   : > { %5002 = vmatpush3.bf16.msra.mxu1 %v4999_v60 }
 0x52d   : > { %5004 = vmatprep.subr.bf16.mxu1 %v5003_v62 }
 0x530   : > { %5006 = vmatpush3.bf16.msra.mxu1 %v5003_v62 }
 0x531   : > { %5008 = vmatprep.subr.bf16.mxu1 %v5007_v1 }
 0x534   : > { %5010 = vmatpush3.bf16.msra.mxu1 %v5007_v1 }
 0x535   : > { %5012 = vmatprep.subr.bf16.mxu1 %v5011_v54 }
 0x538   : > { %5014 = vmatpush3.bf16.msra.mxu1 %v5011_v54  ;;  %v2444_v54 = vld [vmem:[#allocation13 + $0x20] sm:$0xff] }
 0x539   : > { %5016 = vmatprep.subr.bf16.mxu1 %v5015_v6 }
 0x53c   : > { %5018 = vmatpush3.bf16.msra.mxu1 %v5015_v6  ;;  %v5095_v6 = vpack.c.bf16 %v2445_v4, %v2444_v54  ;;  %v2737_v54 = vld [vmem:[#allocation13 + $0x1e8] sm:$0xff] }
 0x53d   : > { %5020 = vmatprep.subr.bf16.mxu1 %v5019_v9 }
 0x540   : > { %5022 = vmatpush3.bf16.msra.mxu1 %v5019_v9  ;;  %v5099_v9 = vpack.c.bf16 %v2447_v8, %v2446_v7  ;;  %v2820_v8 = vld [vmem:[#allocation13 + $0x200] sm:$0xff] }
 0x541   : > { %5024 = vmatprep.subr.bf16.mxu1 %v5023_v12 }
 0x543   : > { %4203 = vmatmul.mubr.f32.vlgmr.msra.gmra.mrb[4].mxu1 %v2234_v16  ;;  %v2452_v16 = vld [vmem:[#allocation13 + $0x60] sm:$0xff] }
 0x544   : > { %5026 = vmatpush3.bf16.msra.mxu1 %v5023_v12  ;;  %4237 = vmatprep.mubr.f32.mxu1 %v2329_v19  ;;  %v5103_v12 = vpack.c.bf16 %v2449_v11, %v2448_v10  ;;  %v5111_v18 = vpack.c.bf16 %v2453_v17, %v2452_v16  ;;  %v2454_v19 = vld [vmem:[#allocation13 + $0x70] sm:$0xff]  ;;  %v2825_v16 = vld [vmem:[#allocation13 + $0x228] sm:$0xff] }
 0x545   : > { %5028 = vmatprep.subr.bf16.mxu1 %v5027_v15  ;;  %v2822_v11 = vld [vmem:[#allocation13 + $0x210] sm:$0xff] }
 0x548   : > { %5030 = vmatpush3.bf16.msra.mxu1 %v5027_v15  ;;  %v5107_v15 = vpack.c.bf16 %v2451_v14, %v2450_v13 }
 0x549   : > { %5032 = vmatprep.subr.bf16.mxu1 %v5031_v20 }
 0x54c   : > { %5034 = vmatpush3.bf16.msra.mxu1 %v5031_v20  ;;  %v2455_v20 = vld [vmem:[#allocation13 + $0x78] sm:$0xff] }
 0x54d   : > { %5036 = vmatprep.subr.bf16.mxu1 %v5035_v23  ;;  %v5115_v21 = vpack.c.bf16 %v2455_v20, %v2454_v19  ;;  %v2826_v19 = vld [vmem:[#allocation13 + $0x230] sm:$0xff]  ;;  %v2827_v20 = vld [vmem:[#allocation13 + $0x238] sm:$0xff] }
 0x550   : > { %5038 = vmatpush3.bf16.msra.mxu1 %v5035_v23  ;;  %v2629_v23 = vld [vmem:[#allocation13 + $0x108] sm:$0xff] }
 0x551   : > { %5040 = vmatprep.subr.bf16.mxu1 %v5039_v26  ;;  %v5119_v24 = vpack.c.bf16 %v2629_v23, %v2628_v22  ;;  %v2828_v22 = vld [vmem:[#allocation13 + $0x240] sm:$0xff]  ;;  %v2829_v23 = vld [vmem:[#allocation13 + $0x248] sm:$0xff] }
 0x554   : > { %5042 = vmatpush3.bf16.msra.mxu1 %v5039_v26  ;;  %v2631_v26 = vld [vmem:[#allocation13 + $0x118] sm:$0xff] }
 0x555   : > { %5044 = vmatprep.subr.bf16.mxu1 %v5043_v29  ;;  %v5123_v27 = vpack.c.bf16 %v2631_v26, %v2630_v25  ;;  %v2830_v25 = vld [vmem:[#allocation13 + $0x250] sm:$0xff]  ;;  %v2831_v26 = vld [vmem:[#allocation13 + $0x258] sm:$0xff] }
 0x558   : > { %5046 = vmatpush3.bf16.msra.mxu1 %v5043_v29  ;;  %v2632_v29 = vld [vmem:[#allocation13 + $0x120] sm:$0xff] }
 0x559   : > { %5048 = vmatprep.subr.bf16.mxu1 %v5047_v32  ;;  %v5127_v31 = vpack.c.bf16 %v2633_v30, %v2632_v29  ;;  %v2833_v29 = vld [vmem:[#allocation13 + $0x268] sm:$0xff] }
 0x55c   : > { %5050 = vmatpush3.bf16.msra.mxu1 %v5047_v32  ;;  %v2634_v32 = vld [vmem:[#allocation13 + $0x130] sm:$0xff] }
 0x55d   : > { %5052 = vmatprep.subr.bf16.mxu1 %v5051_v35  ;;  %v5131_v34 = vpack.c.bf16 %v2635_v33, %v2634_v32  ;;  %v2835_v32 = vld [vmem:[#allocation13 + $0x278] sm:$0xff] }
 0x560   : > { %5054 = vmatpush3.bf16.msra.mxu1 %v5051_v35  ;;  %v2636_v35 = vld [vmem:[#allocation13 + $0x140] sm:$0xff] }
 0x563   : > { %4238 = vmatmul.mubr.f32.vlgmr.msra.gmra.mrb[4].mxu1 %v2330_v36  ;;  %v2637_v36 = vld [vmem:[#allocation13 + $0x148] sm:$0xff] }
 0x564   : > { %v5135_v37 = vpack.c.bf16 %v2637_v36, %v2636_v35  ;;  %v3082_v35 = vld [vmem:[%s6108_s12] ss:$0 sm:$0xff] }
 0x636   : > { %v4239_v58 = vpop.f32.mrb[4].mxu1 }
 0x637   : > { %v2433_v59 = vadd.f32 %v4239_v58, %v3081_v57  ;;  %v2414_v60 = vpop.f32.mrb[5].mxu1 }
 0x638   : > { %v2432_v47 = vadd.f32 %v3081_v57, %v2414_v60  ;;  %v2731_v60 = vld [vmem:[#allocation13 + $0x1b8] sm:$0xff] }
 0x639   : > { %5369 = vtanh.f32 %v2433_v59  ;;  %v2730_v59 = vld [vmem:[#allocation13 + $0x1b0] sm:$0xff] }
 0x63a   : > { %5371 = vtanh.f32 %v2432_v47  ;;  %v5163_v47 = vpack.c.bf16 %v2731_v60, %v2730_v59 }
 0x643   : > { %v6010_v61 = vpop.eup %5369 }
 0x644   : > { %v5372_v62 = vpop.eup %5371  ;;  %2437 = vst [vmem:[#allocation2 + $0x10] sm:$0xff] %v6010_v61 }
 0x645   : > { %2436 = vst [vmem:[#allocation2 + $0x8] sm:$0xff] %v5372_v62 }
 0x64b   : > { %v2722_v14 = vld [vmem:[#allocation2 + $0x11] sm:$0xff] }
 0x64c   : > { %v2456_v1 = vld [vmem:[#allocation2 + $0x7] sm:$0xff]  ;;  %v2457_v2 = vld [vmem:[#allocation2 + $0xf] sm:$0xff] }
 0x64d   : > { %4272 = vmatprep.mubr.f32.mxu0 %v2456_v1  ;;  %v2438_v5 = vld [vmem:[#allocation2 + $0x6] sm:$0xff]  ;;  %v2439_v28 = vld [vmem:[#allocation2 + $0xe] sm:$0xff] }
 0x64e   : > { %4273 = vmatmul.mubr.f32.vlgmr.msra.gmra.mrb[4].mxu0 %v2457_v2  ;;  %v2721_v57 = vld [vmem:[#allocation2 + $0x9] sm:$0xff]  ;;  %v2735_v2 = vld [vmem:[#allocation13 + $0x1d8] sm:$0xff] }
 0x64f   : > { %5090 = vmatpush3.bf16.msra.mxu0 %v5087_v56  ;;  %4307 = vmatprep.mubr.f32.mxu0 %v2438_v5  ;;  %v2729_v56 = vld [vmem:[#allocation13 + $0x1a8] sm:$0xff]  ;;  %v2734_v1 = vld [vmem:[#allocation13 + $0x1d0] sm:$0xff] }
 0x650   : > { %5092 = vmatprep.subr.bf16.mxu0 %v5091_v3  ;;  %v5159_v58 = vpack.c.bf16 %v2729_v56, %v2728_v55  ;;  %v2738_v5 = vld [vmem:[#allocation13 + $0x1f0] sm:$0xff] }
 0x651   : > { %v2817_v17 = vld [vmem:[#allocation2 + $0xa] sm:$0xff] }
 0x653   : > { %5094 = vmatpush3.bf16.msra.mxu0 %v5091_v3  ;;  %v2736_v3 = vld [vmem:[#allocation13 + $0x1e0] sm:$0xff] }
 0x654   : > { %5096 = vmatprep.subr.bf16.mxu0 %v5095_v6  ;;  %v5175_v4 = vpack.c.bf16 %v2737_v54, %v2736_v3 }
 0x657   : > { %5098 = vmatpush3.bf16.msra.mxu0 %v5095_v6  ;;  %v2739_v6 = vld [vmem:[#allocation13 + $0x1f8] sm:$0xff] }
 0x658   : > { %5100 = vmatprep.subr.bf16.mxu0 %v5099_v9  ;;  %v5179_v7 = vpack.c.bf16 %v2739_v6, %v2738_v5 }
 0x65b   : > { %5102 = vmatpush3.bf16.msra.mxu0 %v5099_v9  ;;  %v2821_v9 = vld [vmem:[#allocation13 + $0x208] sm:$0xff] }
 0x65c   : > { %5104 = vmatprep.subr.bf16.mxu0 %v5103_v12  ;;  %v5183_v10 = vpack.c.bf16 %v2821_v9, %v2820_v8 }
 0x65f   : > { %5106 = vmatpush3.bf16.msra.mxu0 %v5103_v12  ;;  %v2823_v12 = vld [vmem:[#allocation13 + $0x218] sm:$0xff] }
 0x660   : > { %5108 = vmatprep.subr.bf16.mxu0 %v5107_v15  ;;  %v5187_v13 = vpack.c.bf16 %v2823_v12, %v2822_v11 }
 0x663   : > { %5110 = vmatpush3.bf16.msra.mxu0 %v5107_v15  ;;  %v2824_v15 = vld [vmem:[#allocation13 + $0x220] sm:$0xff] }
 0x664   : > { %5112 = vmatprep.subr.bf16.mxu0 %v5111_v18 }
 0x667   : > { %5114 = vmatpush3.bf16.msra.mxu0 %v5111_v18  ;;  %v5191_v18 = vpack.c.bf16 %v2825_v16, %v2824_v15 }
 0x668   : > { %5116 = vmatprep.subr.bf16.mxu0 %v5115_v21 }
 0x66b   : > { %5118 = vmatpush3.bf16.msra.mxu0 %v5115_v21  ;;  %v5195_v21 = vpack.c.bf16 %v2827_v20, %v2826_v19 }
 0x66c   : > { %5120 = vmatprep.subr.bf16.mxu0 %v5119_v24 }
 0x66e   : > { %4308 = vmatmul.mubr.f32.vlgmr.msra.gmra.mrb[4].mxu0 %v2439_v28  ;;  %v2832_v28 = vld [vmem:[#allocation13 + $0x260] sm:$0xff] }
 0x66f   : > { %5122 = vmatpush3.bf16.msra.mxu0 %v5119_v24  ;;  %4342 = vmatprep.mubr.f32.mxu0 %v5372_v62  ;;  %v2732_v62 = vld [vmem:[#allocation13 + $0x1c0] sm:$0xff]  ;;  %v5199_v24 = vpack.c.bf16 %v2829_v23, %v2828_v22  ;;  %v5207_v30 = vpack.c.bf16 %v2833_v29, %v2832_v28 }
 0x670   : > { %5124 = vmatprep.subr.bf16.mxu0 %v5123_v27  ;;  %v5167_v0 = vpack.c.bf16 %v2733_v63, %v2732_v62 }
 0x673   : > { %5126 = vmatpush3.bf16.msra.mxu0 %v5123_v27  ;;  %v5203_v27 = vpack.c.bf16 %v2831_v26, %v2830_v25 }
 0x674   : > { %5128 = vmatprep.subr.bf16.mxu0 %v5127_v31 }
 0x677   : > { %5130 = vmatpush3.bf16.msra.mxu0 %v5127_v31  ;;  %v2834_v31 = vld [vmem:[#allocation13 + $0x270] sm:$0xff] }
 0x678   : > { %5132 = vmatprep.subr.bf16.mxu0 %v5131_v34  ;;  %v5211_v33 = vpack.c.bf16 %v2835_v32, %v2834_v31 }
 0x67b   : > { %5134 = vmatpush3.bf16.msra.mxu0 %v5131_v34  ;;  %v2818_v34 = vld [vmem:[#allocation2 + $0x12] sm:$0xff] }
 0x67c   : > { %5136 = vmatprep.subr.bf16.mxu0 %v5135_v37 }
 0x67f   : > { %5138 = vmatpush3.bf16.msra.mxu0 %v5135_v37 }
 0x680   : > { %5140 = vmatprep.subr.bf16.mxu0 %v5139_v41 }
 0x683   : > { %5142 = vmatpush3.bf16.msra.mxu0 %v5139_v41 }
 0x684   : > { %5144 = vmatprep.subr.bf16.mxu0 %v5143_v44 }
 0x687   : > { %5146 = vmatpush3.bf16.msra.mxu0 %v5143_v44 }
 0x688   : > { %5148 = vmatprep.subr.bf16.mxu0 %v5147_v48 }
 0x68b   : > { %5150 = vmatpush3.bf16.msra.mxu0 %v5147_v48 }
 0x68c   : > { %5152 = vmatprep.subr.bf16.mxu0 %v5151_v51 }
 0x68e   : > { %4343 = vmatmul.mubr.f32.vlgmr.msra.gmra.mrb[4].mxu0 %v6010_v61  ;;  %v5171_v61 = vpack.c.bf16 %v2735_v2, %v2734_v1 }
 0x68f   : > { %5154 = vmatpush3.bf16.msra.mxu0 %v5151_v51  ;;  %4377 = vmatprep.mubr.f32.mxu0 %v2721_v57 }
 0x690   : > { %5156 = vmatprep.subr.bf16.mxu0 %v5155_v39 }
 0x693   : > { %5158 = vmatpush3.bf16.msra.mxu0 %v5155_v39 }
 0x694   : > { %5160 = vmatprep.subr.bf16.mxu0 %v5159_v58 }
 0x697   : > { %5162 = vmatpush3.bf16.msra.mxu0 %v5159_v58 }
 0x698   : > { %5164 = vmatprep.subr.bf16.mxu0 %v5163_v47 }
 0x69b   : > { %5166 = vmatpush3.bf16.msra.mxu0 %v5163_v47 }
 0x69c   : > { %5168 = vmatprep.subr.bf16.mxu0 %v5167_v0 }
 0x69f   : > { %5170 = vmatpush3.bf16.msra.mxu0 %v5167_v0 }
 0x6a0   : > { %5172 = vmatprep.subr.bf16.mxu0 %v5171_v61 }
 0x6a3   : > { %5174 = vmatpush3.bf16.msra.mxu0 %v5171_v61 }
 0x6a4   : > { %5176 = vmatprep.subr.bf16.mxu0 %v5175_v4 }
 0x6a7   : > { %5178 = vmatpush3.bf16.msra.mxu0 %v5175_v4 }
 0x6a8   : > { %5180 = vmatprep.subr.bf16.mxu0 %v5179_v7 }
 0x6ab   : > { %5182 = vmatpush3.bf16.msra.mxu0 %v5179_v7 }
 0x6ac   : > { %5184 = vmatprep.subr.bf16.mxu0 %v5183_v10 }
 0x6ae   : > { %4378 = vmatmul.mubr.f32.vlgmr.msra.gmra.mrb[4].mxu0 %v2722_v14 }
 0x6af   : > { %5186 = vmatpush3.bf16.msra.mxu0 %v5183_v10  ;;  %4412 = vmatprep.mubr.f32.mxu0 %v2817_v17 }
 0x6b0   : > { %5188 = vmatprep.subr.bf16.mxu0 %v5187_v13 }
 0x6b3   : > { %5190 = vmatpush3.bf16.msra.mxu0 %v5187_v13 }
 0x6b4   : > { %5192 = vmatprep.subr.bf16.mxu0 %v5191_v18 }
 0x6b7   : > { %5194 = vmatpush3.bf16.msra.mxu0 %v5191_v18 }
 0x6b8   : > { %5196 = vmatprep.subr.bf16.mxu0 %v5195_v21 }
 0x6bb   : > { %5198 = vmatpush3.bf16.msra.mxu0 %v5195_v21 }
 0x6bc   : > { %5200 = vmatprep.subr.bf16.mxu0 %v5199_v24 }
 0x6bf   : > { %5202 = vmatpush3.bf16.msra.mxu0 %v5199_v24 }
 0x6c0   : > { %5204 = vmatprep.subr.bf16.mxu0 %v5203_v27 }
 0x6c3   : > { %5206 = vmatpush3.bf16.msra.mxu0 %v5203_v27 }
 0x6c4   : > { %5208 = vmatprep.subr.bf16.mxu0 %v5207_v30 }
 0x6c7   : > { %5210 = vmatpush3.bf16.msra.mxu0 %v5207_v30 }
 0x6c8   : > { %5212 = vmatprep.subr.bf16.mxu0 %v5211_v33 }
 0x6cb   : > { %5214 = vmatpush3.bf16.msra.mxu0 %v5211_v33 }
 0x6ce   : > { %4413 = vmatmul.mubr.f32.vlgmr.msra.gmra.mrb[4].mxu0 %v2818_v34 }
 0x7a1   : > { %v4414_v36 = vpop.f32.mrb[4].mxu0 }
 0x7a2   : > { %v2921_v37 = vadd.f32 %v4414_v36, %v3082_v35  ;;  %v2902_v38 = vpop.f32.mrb[5].mxu0 }
 0x7a3   : > { %v2920_v40 = vadd.f32 %v3082_v35, %v2902_v38 }
 0x7a4   : > { %2923 = vst [vmem:[%s477_s30 + $0x8] sm:$0xff] %v2921_v37 }
 0x7a5   : > { %2922 = vst [vmem:[%s477_s30] sm:$0xff] %v2920_v40 }
 0x7a6   : > { %5556 = shalt.err (!%p5553_p8)
}
 0x7a7   : > { %s5557_s30 = scalar_lea.hbm %s6025_s25, 256  ;;  %s5561_s13 = scalar_lea.hbm %s6109_s9, 512 }
 0x7a8   : > { %p5558_p6 = scmp.ne.s32.totalorder %s6025_s25, %s5557_s30  ;;  %p5562_p3 = scmp.lt.u32.totalorder %s6025_s25, %s6109_s9 }
 0x7a9   : > { %p5563_p5 = scmp.lt.u32.totalorder %s5561_s13, %s5557_s30  ;;  %p5565_p7 = scmp.lt.u32.totalorder %s5557_s30, %s6025_s25 }
 0x7aa   : > { %p5559_p10 = pnand %p5558_p6, %p6110_p4 }
 0x7ab   : > { %p5564_p9 = por %p5563_p5, %p5562_p3 }
 0x7ac   : > { %p5560_p11 = pneg %p5559_p10 }
 0x7ad   : > { %p5566_p12 = por %p5565_p7, %p5564_p9 }
 0x7af   : > { %p5567_p1 = pnand %p5566_p12, %p5560_p11 }
 0x7b1   : > { %5570 = shalt.err (!%p5567_p1)
}
 0x7b2   : > { %s5633_s28 = smov 128   ;;  %s5634_s23 = smov 8  }
 0x7b3   : > { %5277 = dma.vmem_to_hbm [thread:$0]  (%p6110_p4), %s6020_s15, 256, %s6025_s25, %s2925_s29, %s5633_s28, %s5633_s28, %s5634_s23  }
 0x7b4 PF: > { %s2953_s22 = sand.u32 1, %s5609_s17   ;;  %p6111_p13 = scmp.ne.s32.totalorder %s6097_s21, 0 }
 0x7b5   : > { %p6112_p0 = scmp.ge.s32.totalorder %s5621_s20, 2  ;;  %s2954_s27 = scalar_lea.sflag [#allocation6], %s2953_s22 }
 0x7b7   : > { %p5300_p2 = pnand %p6112_p0, %p6111_p13 }
 0x7b9   : > { %5604 = dma.done.wait (!%p5300_p2), %s2954_s27, 256  }
 0x7ba   : > { %5606 = vsyncadd (!%p5300_p2), %s2954_s27, 4294967040  ;;  %p27_p8 = scmp.ge.s32.totalorder %s5868_s16, 4   ;;  %s6113_s17 = smov %s5613_s18 }
 0x7bb   : > { %s6114_s18 = smov %s5617_s19  ;;  %s6115_s19 = smov %s5880_s10 }
 0x7bc   : > { %s6116_s20 = smov %s5868_s16  ;;  %29 = sbr.rel (!%p27_p8) target bundleno = 13 (0xd), region = 149 }
 0x7c3   :  { %2959 = vsyncpa [#allocation5], 1 }
 0x7c4   :  { %2961 = vsyncpa [#allocation5 + $0x1], 1 }
 0x7c5   :  { %2962 = vsyncpa [#allocation8], 1 }
 0x7c6   :  { %2963 = vsyncpa [#allocation11], 1 }
 0x7c7   :  { %2964 = vsyncpa [#allocation14], 1 }
 0x7c8   :  { %2965 = vsyncpa [#allocation6], 1 }
 0x7c9   :  { %2967 = vsyncpa [#allocation6 + $0x1], 1 }

</bundles_post_ra>
